<compile_context>
chip_gen: v5e
topology: v5e:2x2
jax: 0.10.0
libtpu: 0.0.40
codegen_flags: <defaults>
</compile_context>

<pallas_src>
import functools

import jax
import jax.numpy as jnp
from jax.experimental import pallas as pl
from jax.experimental.pallas import tpu as pltpu


# ----------------------------- kernel -------------------------------------- #

def _layer_norm(x, gamma, beta, eps=1e-5):
    mu = jnp.mean(x, axis=-1, keepdims=True)
    var = jnp.mean((x - mu) ** 2, axis=-1, keepdims=True)
    return (x - mu) * jax.lax.rsqrt(var + eps) * gamma + beta


def _mm(a, b):
    # MXU matmul: bf16 operands, f32 accumulation.
    return jnp.dot(a.astype(jnp.bfloat16), b, preferred_element_type=jnp.float32)


def _encoder_layer(x, mask_add, wqkv, bqkv, wo, bo, g1, be1,
                   w1, bf1, w2, bf2, g2, be2, *, num_head):
    """One post-LN transformer encoder layer on a single sequence [S, E]."""
    S, E = x.shape
    Dh = E // num_head

    # Fused QKV projection (1/sqrt(Dh) already folded into wq/bq host-side).
    qkv = _mm(x, wqkv) + bqkv                                    # [S, 3E] f32

    # E-boundary column slices (lane-tile aligned once E % 128 == 0 at real
    # sizes), then one reshape + one lane-layout-aware transpose per tensor.
    # No per-head Dh-wide slicing / jnp.stack / jnp.concatenate.
    q3 = qkv[:, :E].astype(jnp.bfloat16).reshape(S, num_head, Dh)
    k3 = qkv[:, E:2 * E].astype(jnp.bfloat16).reshape(S, num_head, Dh)
    v3 = qkv[:, 2 * E:].astype(jnp.bfloat16).reshape(S, num_head, Dh)
    qh = pltpu.einshape("shd->hsd", q3)                          # [H, S, Dh]
    kh = pltpu.einshape("shd->hsd", k3)
    vh = pltpu.einshape("shd->hsd", v3)

    # Head-batched attention scores; mask_add is the [1, S] additive key-pad
    # vector for this sequence (broadcast over heads and queries).
    sc = jnp.einsum("hqd,hkd->hqk", qh, kh,
                    preferred_element_type=jnp.float32)          # [H, S, S]
    sc = sc + mask_add[None, :, :]
    # NOTE: fully-masked rows give a uniform softmax (vs NaN for -inf fill).
    sc = sc - jnp.max(sc, axis=-1, keepdims=True)
    p = jnp.exp(sc)
    p = p * pl.reciprocal(jnp.sum(p, axis=-1, keepdims=True), approx=True)
    # TODO(synk): for long S, tile the KV axis with a flash-style online
    # softmax so the [H,S,S] f32 score tensor never materializes in VMEM.

    ctx = jnp.einsum("hqk,hkd->hqd", p.astype(jnp.bfloat16), vh,
                     preferred_element_type=jnp.float32)         # [H, S, Dh]
    ctx2d = pltpu.einshape("hsd->shd", ctx).reshape(S, E)        # concat heads
    attn = _mm(ctx2d, wo) + bo

    h1 = _layer_norm(x + attn, g1, be1)
    ff = jnp.maximum(_mm(h1, w1) + bf1, 0.0)
    ff = _mm(ff, w2) + bf2
    return _layer_norm(h1 + ff, g2, be2)


def hangman_bert_kernel(x_ref, mask_ref,
                        wqkv_ref, bqkv_ref, wo_ref, bo_ref, g1_ref, be1_ref,
                        w1_ref, bf1_ref, w2_ref, bf2_ref, g2_ref, be2_ref,
                        encw_ref, encb_ref,
                        out_ref, h_ref, *, num_head):
    """Grid = (batch, layer). Residual stream lives in VMEM scratch h_ref."""
    l = pl.program_id(1)

    @pl.when(l == 0)
    def _():
        h_ref[...] = x_ref[...].astype(jnp.float32)     # [S, E] f32 residual

    x = h_ref[...]
    mask_add = mask_ref[...]                            # [1, S]

    new_h = _encoder_layer(
        x, mask_add,
        wqkv_ref[...], bqkv_ref[...], wo_ref[...], bo_ref[...],
        g1_ref[...], be1_ref[...], w1_ref[...], bf1_ref[...],
        w2_ref[...], bf2_ref[...], g2_ref[...], be2_ref[...],
        num_head=num_head)
    h_ref[...] = new_h

    @pl.when(l == pl.num_programs(1) - 1)
    def _():
        # Vocab head; output lane-padded to a multiple of 128 -> unmasked vst.
        out_ref[...] = _mm(new_h, encw_ref[...]) + encb_ref[...]


# ----------------------------- wrapper -------------------------------------- #

def hangman_bert_forward(x_tokens, params, *, num_head, padding_index):
    """Equivalent of HangmanBERT.forward: embed -> encoder -> encoder_dense."""
    B, S = x_tokens.shape
    E = params["word_emb"].shape[1]
    n_vocab = params["enc_w"].shape[1]
    layers = params["layers"]
    L = len(layers)
    Dh = E // num_head
    dff = layers[0]["w1"].shape[1]

    # -- XLA glue: embedding gather + position embedding (no clean dense-tile
    #    Pallas expression for the gather at this scale) --
    emb = params["word_emb"][x_tokens] + params["pos_emb"][None, :S, :]
    x_emb = emb.astype(jnp.bfloat16)                       # [B, S, E] bf16 DMA

    # Additive key-padding mask: one [1, S] vector per sequence (replaces the
    # dense [BS, BS] f32 mask of the folded design).
    mask_add = jnp.where(x_tokens == padding_index, -1e9, 0.0) \
                  .astype(jnp.float32)[:, None, :]         # [B, 1, S]

    # Vocab head lane-padded to a multiple of 128.
    vpad = ((n_vocab + 127) // 128) * 128
    enc_w = jnp.zeros((E, vpad), jnp.bfloat16).at[:, :n_vocab].set(
        params["enc_w"].astype(jnp.bfloat16))
    enc_b = jnp.zeros((1, vpad), jnp.float32).at[:, :n_vocab].set(params["enc_b"])

    # Stacked per-layer weights [L, ...]; fold 1/sqrt(Dh) into wq/bq; fused QKV.
    scale = 1.0 / (Dh ** 0.5)

    def stack(fn, dtype):
        return jnp.stack([fn(lp) for lp in layers], axis=0).astype(dtype)

    wqkv = stack(lambda lp: jnp.concatenate(
        [lp["wq"] * scale, lp["wk"], lp["wv"]], axis=1), jnp.bfloat16)
    bqkv = stack(lambda lp: jnp.concatenate(
        [lp["bq"] * scale, lp["bk"], lp["bv"]], axis=1), jnp.float32)
    wo = stack(lambda lp: lp["wo"], jnp.bfloat16)
    bo = stack(lambda lp: lp["bo"], jnp.float32)
    g1 = stack(lambda lp: lp["g1"], jnp.float32)
    be1 = stack(lambda lp: lp["be1"], jnp.float32)
    w1 = stack(lambda lp: lp["w1"], jnp.bfloat16)
    bf1 = stack(lambda lp: lp["bf1"], jnp.float32)
    w2 = stack(lambda lp: lp["w2"], jnp.bfloat16)
    bf2 = stack(lambda lp: lp["bf2"], jnp.float32)
    g2 = stack(lambda lp: lp["g2"], jnp.float32)
    be2 = stack(lambda lp: lp["be2"], jnp.float32)

    # BlockSpecs: batch-blocked activations, layer-blocked (double-buffered)
    # weights, constant-index vocab head (fetched once).
    x_spec = pl.BlockSpec((None, S, E), lambda b, l: (b, 0, 0))
    m_spec = pl.BlockSpec((None, 1, S), lambda b, l: (b, 0, 0))

    def lw(shape2):
        return pl.BlockSpec((None,) + shape2, lambda b, l: (l, 0, 0))

    in_specs = [
        x_spec, m_spec,
        lw((E, 3 * E)), lw((1, 3 * E)),
        lw((E, E)), lw((1, E)),
        lw((1, E)), lw((1, E)),
        lw((E, dff)), lw((1, dff)),
        lw((dff, E)), lw((1, E)),
        lw((1, E)), lw((1, E)),
        pl.BlockSpec((E, vpad), lambda b, l: (0, 0)),
        pl.BlockSpec((1, vpad), lambda b, l: (0, 0)),
    ]
    out_spec = pl.BlockSpec((None, S, vpad), lambda b, l: (b, 0, 0))

    # Explicit scoped-VMEM limit, sized from the device with headroom (v7x has
    # only 64 MiB physical; defaults are 16/32 MiB).
    try:
        vmem_cap = pltpu.get_tpu_info().vmem_capacity_bytes
    except Exception:
        vmem_cap = 64 * 1024 * 1024
    vmem_limit = min(int(vmem_cap * 3 // 4), 96 * 1024 * 1024)

    # TODO(synk): at realistic sizes, pad E/dff/S so MXU M,N are multiples of
    # 256 (v6e/v7x) / 128 (v5e) and sweep pl.Buffered(2-3) on the weight specs.
    out = pl.pallas_call(
        functools.partial(hangman_bert_kernel, num_head=num_head),
        out_shape=jax.ShapeDtypeStruct((B, S, vpad), jnp.float32),
        grid_spec=pltpu.PrefetchScalarGridSpec(
            num_scalar_prefetch=0,
            grid=(B, L),
            in_specs=in_specs,
            out_specs=out_spec,
            scratch_shapes=[pltpu.VMEM((S, E), jnp.float32)],
        ),
        compiler_params=pltpu.CompilerParams(
            dimension_semantics=("parallel", "arbitrary"),
            vmem_limit_bytes=vmem_limit,
        ),
    )(x_emb, mask_add, wqkv, bqkv, wo, bo, g1, be1, w1, bf1, w2, bf2, g2, be2,
      enc_w, enc_b)

    return out[:, :, :n_vocab]


# ----------------------------- params --------------------------------------- #

def init_params(key, *, max_len, emb_dim, n_vocab, num_layer):
    dff = 4 * emb_dim
    keys = jax.random.split(key, 3 + num_layer)

    def nrm(k, shape, scale=0.02):
        return jax.random.normal(k, shape, jnp.float32) * scale

    params = {
        "word_emb": nrm(keys[0], (n_vocab, emb_dim)),
        "pos_emb": nrm(keys[1], (max_len, emb_dim)),
        "enc_w": nrm(keys[2], (emb_dim, n_vocab)),
        "enc_b": jnp.zeros((1, n_vocab), jnp.float32),
        "layers": [],
    }
    for li in range(num_layer):
        lk = jax.random.split(keys[3 + li], 6)
        params["layers"].append({
            "wq": nrm(lk[0], (emb_dim, emb_dim)),
            "bq": jnp.zeros((1, emb_dim), jnp.float32),
            "wk": nrm(lk[1], (emb_dim, emb_dim)),
            "bk": jnp.zeros((1, emb_dim), jnp.float32),
            "wv": nrm(lk[2], (emb_dim, emb_dim)),
            "bv": jnp.zeros((1, emb_dim), jnp.float32),
            "wo": nrm(lk[3], (emb_dim, emb_dim)),
            "bo": jnp.zeros((1, emb_dim), jnp.float32),
            "g1": jnp.ones((1, emb_dim), jnp.float32),
            "be1": jnp.zeros((1, emb_dim), jnp.float32),
            "w1": nrm(lk[4], (emb_dim, dff)),
            "bf1": jnp.zeros((1, dff), jnp.float32),
            "w2": nrm(lk[5], (dff, emb_dim)),
            "bf2": jnp.zeros((1, emb_dim), jnp.float32),
            "g2": jnp.ones((1, emb_dim), jnp.float32),
            "be2": jnp.zeros((1, emb_dim), jnp.float32),
        })
    return params


# ----------------------------- main ------------------------------------------ #

if __name__ == "__main__":
    MAX_LEN = 8
    EMB_DIM = 32
    N_VOCAB = 29          # 26 letters + pad + mask + unk
    NUM_HEAD = 4
    NUM_LAYER = 2
    PADDING_INDEX = 0
    MASK_INDEX = 1
    BATCH = 2

    key = jax.random.PRNGKey(0)
    pkey, xkey = jax.random.split(key)
    params = init_params(pkey, max_len=MAX_LEN, emb_dim=EMB_DIM,
                         n_vocab=N_VOCAB, num_layer=NUM_LAYER)

    # deterministic token ids in [2, n_vocab), with a few mask / pad positions
    x_tokens = jax.random.randint(xkey, (BATCH, MAX_LEN), 2, N_VOCAB, jnp.int32)
    x_tokens = x_tokens.at[0, 3].set(MASK_INDEX)
    x_tokens = x_tokens.at[1, 5].set(MASK_INDEX)
    x_tokens = x_tokens.at[:, MAX_LEN - 1].set(PADDING_INDEX)

    forward = jax.jit(functools.partial(hangman_bert_forward,
                                        num_head=NUM_HEAD,
                                        padding_index=PADDING_INDEX))
    logits = forward(x_tokens, params)
    logits = jax.block_until_ready(logits)

    assert logits.shape == (BATCH, MAX_LEN, N_VOCAB), logits.shape
    assert bool(jnp.all(jnp.isfinite(logits)))
    print("KERNEL_OK")
</pallas_src>

<mosaic_0001>
module attributes {stable_mosaic.version = 11 : i64} {
  func.func @hangman_bert_kernel(%arg0: i32, %arg1: i32, %arg2: memref<1x8x32xbf16, #tpu.memory_space<vmem>>, %arg3: memref<1x1x8xf32, #tpu.memory_space<vmem>>, %arg4: memref<1x32x96xbf16, #tpu.memory_space<vmem>>, %arg5: memref<1x1x96xf32, #tpu.memory_space<vmem>>, %arg6: memref<1x32x32xbf16, #tpu.memory_space<vmem>>, %arg7: memref<1x1x32xf32, #tpu.memory_space<vmem>>, %arg8: memref<1x1x32xf32, #tpu.memory_space<vmem>>, %arg9: memref<1x1x32xf32, #tpu.memory_space<vmem>>, %arg10: memref<1x32x128xbf16, #tpu.memory_space<vmem>>, %arg11: memref<1x1x128xf32, #tpu.memory_space<vmem>>, %arg12: memref<1x128x32xbf16, #tpu.memory_space<vmem>>, %arg13: memref<1x1x32xf32, #tpu.memory_space<vmem>>, %arg14: memref<1x1x32xf32, #tpu.memory_space<vmem>>, %arg15: memref<1x1x32xf32, #tpu.memory_space<vmem>>, %arg16: memref<32x128xbf16, #tpu.memory_space<vmem>>, %arg17: memref<1x128xf32, #tpu.memory_space<vmem>>, %arg18: memref<1x8x128xf32, #tpu.memory_space<vmem>>, %arg19: memref<8x32xf32, #tpu.memory_space<vmem>>) attributes {dimension_semantics = [#tpu.dimension_semantics<parallel>, #tpu.dimension_semantics<arbitrary>], iteration_bounds = array<i64: 2, 2>, scalar_prefetch = 0 : i64, scratch_operands = 1 : i64, tpu.core_type = #tpu.core_type<tc>, window_params = [{transform_indices = @transform_0, window_bounds = array<i64: 1, 8, 32>}, {transform_indices = @transform_1, window_bounds = array<i64: 1, 1, 8>}, {transform_indices = @transform_2, window_bounds = array<i64: 1, 32, 96>}, {transform_indices = @transform_3, window_bounds = array<i64: 1, 1, 96>}, {transform_indices = @transform_4, window_bounds = array<i64: 1, 32, 32>}, {transform_indices = @transform_5, window_bounds = array<i64: 1, 1, 32>}, {transform_indices = @transform_6, window_bounds = array<i64: 1, 1, 32>}, {transform_indices = @transform_7, window_bounds = array<i64: 1, 1, 32>}, {transform_indices = @transform_8, window_bounds = array<i64: 1, 32, 128>}, {transform_indices = @transform_9, window_bounds = array<i64: 1, 1, 128>}, {transform_indices = @transform_10, window_bounds = array<i64: 1, 128, 32>}, {transform_indices = @transform_11, window_bounds = array<i64: 1, 1, 32>}, {transform_indices = @transform_12, window_bounds = array<i64: 1, 1, 32>}, {transform_indices = @transform_13, window_bounds = array<i64: 1, 1, 32>}, {pipeline_mode = #tpu.pipeline_mode<synchronous>, transform_indices = @transform_14, window_bounds = array<i64: 32, 128>}, {pipeline_mode = #tpu.pipeline_mode<synchronous>, transform_indices = @transform_15, window_bounds = array<i64: 1, 128>}, {transform_indices = @transform_16, window_bounds = array<i64: 1, 8, 128>}]} {
    %c0_i32 = arith.constant 0 : i32
    %0 = arith.cmpi eq, %arg1, %c0_i32 : i32
    %1 = arith.extui %0 : i1 to i32
    %c0_i32_0 = arith.constant 0 : i32
    %2 = arith.cmpi ne, %1, %c0_i32_0 : i32
    scf.if %2 {
      %c0_62 = arith.constant 0 : index
      %c0_63 = arith.constant 0 : index
      %c0_64 = arith.constant 0 : index
      %128 = vector.load %arg2[%c0_62, %c0_63, %c0_64] : memref<1x8x32xbf16, #tpu.memory_space<vmem>>, vector<1x8x32xbf16>
      %129 = vector.shape_cast %128 : vector<1x8x32xbf16> to vector<8x32xbf16>
      %130 = arith.extf %129 : vector<8x32xbf16> to vector<8x32xf32>
      %c0_65 = arith.constant 0 : index
      %c0_66 = arith.constant 0 : index
      %131 = vector.load %arg19[%c0_65, %c0_66] : memref<8x32xf32, #tpu.memory_space<vmem>>, vector<8x32xf32>
      tpu.vector_store %arg19[%c0_65, %c0_66], %130 {strides = array<i32>} : memref<8x32xf32, #tpu.memory_space<vmem>>, vector<8x32xf32>,
    } else {
    }
    %c0 = arith.constant 0 : index
    %c0_1 = arith.constant 0 : index
    %3 = vector.load %arg19[%c0, %c0_1] : memref<8x32xf32, #tpu.memory_space<vmem>>, vector<8x32xf32>
    %c0_2 = arith.constant 0 : index
    %c0_3 = arith.constant 0 : index
    %c0_4 = arith.constant 0 : index
    %4 = vector.load %arg3[%c0_2, %c0_3, %c0_4] : memref<1x1x8xf32, #tpu.memory_space<vmem>>, vector<1x1x8xf32>
    %5 = vector.shape_cast %4 : vector<1x1x8xf32> to vector<1x8xf32>
    %c0_5 = arith.constant 0 : index
    %c0_6 = arith.constant 0 : index
    %c0_7 = arith.constant 0 : index
    %6 = vector.load %arg4[%c0_5, %c0_6, %c0_7] : memref<1x32x96xbf16, #tpu.memory_space<vmem>>, vector<1x32x96xbf16>
    %7 = vector.shape_cast %6 : vector<1x32x96xbf16> to vector<32x96xbf16>
    %c0_8 = arith.constant 0 : index
    %c0_9 = arith.constant 0 : index
    %c0_10 = arith.constant 0 : index
    %8 = vector.load %arg5[%c0_8, %c0_9, %c0_10] : memref<1x1x96xf32, #tpu.memory_space<vmem>>, vector<1x1x96xf32>
    %9 = vector.shape_cast %8 : vector<1x1x96xf32> to vector<1x96xf32>
    %c0_11 = arith.constant 0 : index
    %c0_12 = arith.constant 0 : index
    %c0_13 = arith.constant 0 : index
    %10 = vector.load %arg6[%c0_11, %c0_12, %c0_13] : memref<1x32x32xbf16, #tpu.memory_space<vmem>>, vector<1x32x32xbf16>
    %11 = vector.shape_cast %10 : vector<1x32x32xbf16> to vector<32x32xbf16>
    %c0_14 = arith.constant 0 : index
    %c0_15 = arith.constant 0 : index
    %c0_16 = arith.constant 0 : index
    %12 = vector.load %arg7[%c0_14, %c0_15, %c0_16] : memref<1x1x32xf32, #tpu.memory_space<vmem>>, vector<1x1x32xf32>
    %13 = vector.shape_cast %12 : vector<1x1x32xf32> to vector<1x32xf32>
    %c0_17 = arith.constant 0 : index
    %c0_18 = arith.constant 0 : index
    %c0_19 = arith.constant 0 : index
    %14 = vector.load %arg8[%c0_17, %c0_18, %c0_19] : memref<1x1x32xf32, #tpu.memory_space<vmem>>, vector<1x1x32xf32>
    %15 = vector.shape_cast %14 : vector<1x1x32xf32> to vector<1x32xf32>
    %c0_20 = arith.constant 0 : index
    %c0_21 = arith.constant 0 : index
    %c0_22 = arith.constant 0 : index
    %16 = vector.load %arg9[%c0_20, %c0_21, %c0_22] : memref<1x1x32xf32, #tpu.memory_space<vmem>>, vector<1x1x32xf32>
    %17 = vector.shape_cast %16 : vector<1x1x32xf32> to vector<1x32xf32>
    %c0_23 = arith.constant 0 : index
    %c0_24 = arith.constant 0 : index
    %c0_25 = arith.constant 0 : index
    %18 = vector.load %arg10[%c0_23, %c0_24, %c0_25] : memref<1x32x128xbf16, #tpu.memory_space<vmem>>, vector<1x32x128xbf16>
    %19 = vector.shape_cast %18 : vector<1x32x128xbf16> to vector<32x128xbf16>
    %c0_26 = arith.constant 0 : index
    %c0_27 = arith.constant 0 : index
    %c0_28 = arith.constant 0 : index
    %20 = vector.load %arg11[%c0_26, %c0_27, %c0_28] : memref<1x1x128xf32, #tpu.memory_space<vmem>>, vector<1x1x128xf32>
    %21 = vector.shape_cast %20 : vector<1x1x128xf32> to vector<1x128xf32>
    %c0_29 = arith.constant 0 : index
    %c0_30 = arith.constant 0 : index
    %c0_31 = arith.constant 0 : index
    %22 = vector.load %arg12[%c0_29, %c0_30, %c0_31] : memref<1x128x32xbf16, #tpu.memory_space<vmem>>, vector<1x128x32xbf16>
    %23 = vector.shape_cast %22 : vector<1x128x32xbf16> to vector<128x32xbf16>
    %c0_32 = arith.constant 0 : index
    %c0_33 = arith.constant 0 : index
    %c0_34 = arith.constant 0 : index
    %24 = vector.load %arg13[%c0_32, %c0_33, %c0_34] : memref<1x1x32xf32, #tpu.memory_space<vmem>>, vector<1x1x32xf32>
    %25 = vector.shape_cast %24 : vector<1x1x32xf32> to vector<1x32xf32>
    %c0_35 = arith.constant 0 : index
    %c0_36 = arith.constant 0 : index
    %c0_37 = arith.constant 0 : index
    %26 = vector.load %arg14[%c0_35, %c0_36, %c0_37] : memref<1x1x32xf32, #tpu.memory_space<vmem>>, vector<1x1x32xf32>
    %27 = vector.shape_cast %26 : vector<1x1x32xf32> to vector<1x32xf32>
    %c0_38 = arith.constant 0 : index
    %c0_39 = arith.constant 0 : index
    %c0_40 = arith.constant 0 : index
    %28 = vector.load %arg15[%c0_38, %c0_39, %c0_40] : memref<1x1x32xf32, #tpu.memory_space<vmem>>, vector<1x1x32xf32>
    %29 = vector.shape_cast %28 : vector<1x1x32xf32> to vector<1x32xf32>
    %30 = arith.truncf %3 : vector<8x32xf32> to vector<8x32xbf16>
    %cst = arith.constant dense<0.000000e+00> : vector<8x96xf32>
    %31 = tpu.matmul %30, %7, %cst {dimension_numbers = #tpu.dot_dimension_numbers<[1], [0], [0], [1], [0, 0, 1, 1], [], []>} : vector<8x32xbf16>, vector<32x96xbf16>, vector<8x96xf32> -> vector<8x96xf32>
    %32 = vector.broadcast %9 : vector<1x96xf32> to vector<8x96xf32>
    %33 = arith.addf %31, %32 : vector<8x96xf32>
    %34 = vector.extract_strided_slice %33 {offsets = [0, 0], sizes = [8, 32], strides = [1, 1]} : vector<8x96xf32> to vector<8x32xf32>
    %35 = arith.truncf %34 : vector<8x32xf32> to vector<8x32xbf16>
    %36 = vector.shape_cast %35 : vector<8x32xbf16> to vector<8x4x8xbf16>
    %37 = vector.extract_strided_slice %33 {offsets = [0, 32], sizes = [8, 32], strides = [1, 1]} : vector<8x96xf32> to vector<8x32xf32>
    %38 = arith.truncf %37 : vector<8x32xf32> to vector<8x32xbf16>
    %39 = vector.shape_cast %38 : vector<8x32xbf16> to vector<8x4x8xbf16>
    %40 = vector.extract_strided_slice %33 {offsets = [0, 64], sizes = [8, 32], strides = [1, 1]} : vector<8x96xf32> to vector<8x32xf32>
    %41 = arith.truncf %40 : vector<8x32xf32> to vector<8x32xbf16>
    %42 = vector.shape_cast %41 : vector<8x32xbf16> to vector<8x4x8xbf16>
    %43 = tpu.transpose %36, [1, 0, 2] : vector<8x4x8xbf16> -> vector<4x8x8xbf16>
    %44 = tpu.transpose %39, [1, 0, 2] : vector<8x4x8xbf16> -> vector<4x8x8xbf16>
    %45 = tpu.transpose %42, [1, 0, 2] : vector<8x4x8xbf16> -> vector<4x8x8xbf16>
    "tpu.trace_start"() <{level = 10 : i32, message = "hqd,hkd->hqk"}> : () -> ()
    %cst_41 = arith.constant dense<0.000000e+00> : vector<4x8x8xf32>
    %46 = tpu.matmul %43, %44, %cst_41 {dimension_numbers = #tpu.dot_dimension_numbers<[2], [2], [1], [1], [0, 0, 0, 1, 1, 1], [0], [0]>} : vector<4x8x8xbf16>, vector<4x8x8xbf16>, vector<4x8x8xf32> -> vector<4x8x8xf32>
    "tpu.trace_stop"() : () -> ()
    %47 = vector.shape_cast %5 : vector<1x8xf32> to vector<1x1x8xf32>
    %48 = vector.broadcast %47 : vector<1x1x8xf32> to vector<4x8x8xf32>
    %49 = arith.addf %46, %48 : vector<4x8x8xf32>
    %cst_42 = arith.constant dense<0xFF800000> : vector<4x8xf32>
    %50 = vector.multi_reduction <maximumf>, %49, %cst_42 [2] : vector<4x8x8xf32> to vector<4x8xf32>
    %51 = vector.shape_cast %50 : vector<4x8xf32> to vector<4x8x1xf32>
    %52 = vector.broadcast %51 : vector<4x8x1xf32> to vector<4x8x8xf32>
    %53 = arith.subf %49, %52 : vector<4x8x8xf32>
    %54 = math.exp %53 : vector<4x8x8xf32>
    %cst_43 = arith.constant dense<0.000000e+00> : vector<4x8xf32>
    %55 = vector.multi_reduction <add>, %54, %cst_43 [2] : vector<4x8x8xf32> to vector<4x8xf32>
    %56 = vector.shape_cast %55 : vector<4x8xf32> to vector<4x8x1xf32>
    %57 = tpu.reciprocal %56 {approx = true} : vector<4x8x1xf32> -> vector<4x8x1xf32>
    %58 = vector.broadcast %57 : vector<4x8x1xf32> to vector<4x8x8xf32>
    %59 = arith.mulf %54, %58 : vector<4x8x8xf32>
    %60 = arith.truncf %59 : vector<4x8x8xf32> to vector<4x8x8xbf16>
    "tpu.trace_start"() <{level = 10 : i32, message = "hqk,hkd->hqd"}> : () -> ()
    %cst_44 = arith.constant dense<0.000000e+00> : vector<4x8x8xf32>
    %61 = tpu.matmul %60, %45, %cst_44 {dimension_numbers = #tpu.dot_dimension_numbers<[2], [1], [1], [2], [0, 0, 0, 1, 1, 2], [0], [0]>} : vector<4x8x8xbf16>, vector<4x8x8xbf16>, vector<4x8x8xf32> -> vector<4x8x8xf32>
    "tpu.trace_stop"() : () -> ()
    %62 = tpu.transpose %61, [1, 0, 2] : vector<4x8x8xf32> -> vector<8x4x8xf32>
    %63 = vector.shape_cast %62 : vector<8x4x8xf32> to vector<8x32xf32>
    %64 = arith.truncf %63 : vector<8x32xf32> to vector<8x32xbf16>
    %cst_45 = arith.constant dense<0.000000e+00> : vector<8x32xf32>
    %65 = tpu.matmul %64, %11, %cst_45 {dimension_numbers = #tpu.dot_dimension_numbers<[1], [0], [0], [1], [0, 0, 1, 1], [], []>} : vector<8x32xbf16>, vector<32x32xbf16>, vector<8x32xf32> -> vector<8x32xf32>
    %66 = vector.broadcast %13 : vector<1x32xf32> to vector<8x32xf32>
    %67 = arith.addf %65, %66 : vector<8x32xf32>
    %68 = arith.addf %3, %67 : vector<8x32xf32>
    %cst_46 = arith.constant dense<0.000000e+00> : vector<8xf32>
    %69 = vector.multi_reduction <add>, %68, %cst_46 [1] : vector<8x32xf32> to vector<8xf32>
    %70 = vector.shape_cast %69 : vector<8xf32> to vector<8x1xf32>
    %cst_47 = arith.constant 3.200000e+01 : f32
    %71 = vector.broadcast %cst_47 : f32 to vector<8x1xf32>
    %72 = arith.divf %70, %71 : vector<8x1xf32>
    %73 = vector.broadcast %72 : vector<8x1xf32> to vector<8x32xf32>
    %74 = arith.subf %68, %73 : vector<8x32xf32>
    %75 = arith.mulf %74, %74 : vector<8x32xf32>
    %cst_48 = arith.constant dense<0.000000e+00> : vector<8xf32>
    %76 = vector.multi_reduction <add>, %75, %cst_48 [1] : vector<8x32xf32> to vector<8xf32>
    %77 = vector.shape_cast %76 : vector<8xf32> to vector<8x1xf32>
    %cst_49 = arith.constant 3.200000e+01 : f32
    %78 = vector.broadcast %cst_49 : f32 to vector<8x1xf32>
    %79 = arith.divf %77, %78 : vector<8x1xf32>
    %80 = vector.broadcast %72 : vector<8x1xf32> to vector<8x32xf32>
    %81 = arith.subf %68, %80 : vector<8x32xf32>
    %cst_50 = arith.constant 9.99999974E-6 : f32
    %82 = vector.broadcast %cst_50 : f32 to vector<8x1xf32>
    %83 = arith.addf %79, %82 : vector<8x1xf32>
    %84 = math.rsqrt %83 : vector<8x1xf32>
    %85 = vector.broadcast %84 : vector<8x1xf32> to vector<8x32xf32>
    %86 = arith.mulf %81, %85 : vector<8x32xf32>
    %87 = vector.broadcast %15 : vector<1x32xf32> to vector<8x32xf32>
    %88 = arith.mulf %86, %87 : vector<8x32xf32>
    %89 = vector.broadcast %17 : vector<1x32xf32> to vector<8x32xf32>
    %90 = arith.addf %88, %89 : vector<8x32xf32>
    %91 = arith.truncf %90 : vector<8x32xf32> to vector<8x32xbf16>
    %cst_51 = arith.constant dense<0.000000e+00> : vector<8x128xf32>
    %92 = tpu.matmul %91, %19, %cst_51 {dimension_numbers = #tpu.dot_dimension_numbers<[1], [0], [0], [1], [0, 0, 1, 1], [], []>} : vector<8x32xbf16>, vector<32x128xbf16>, vector<8x128xf32> -> vector<8x128xf32>
    %93 = vector.broadcast %21 : vector<1x128xf32> to vector<8x128xf32>
    %94 = arith.addf %92, %93 : vector<8x128xf32>
    %cst_52 = arith.constant 0.000000e+00 : f32
    %95 = vector.broadcast %cst_52 : f32 to vector<8x128xf32>
    %96 = arith.maximumf %94, %95 : vector<8x128xf32>
    %97 = arith.truncf %96 : vector<8x128xf32> to vector<8x128xbf16>
    %cst_53 = arith.constant dense<0.000000e+00> : vector<8x32xf32>
    %98 = tpu.matmul %97, %23, %cst_53 {dimension_numbers = #tpu.dot_dimension_numbers<[1], [0], [0], [1], [0, 0, 1, 1], [], []>} : vector<8x128xbf16>, vector<128x32xbf16>, vector<8x32xf32> -> vector<8x32xf32>
    %99 = vector.broadcast %25 : vector<1x32xf32> to vector<8x32xf32>
    %100 = arith.addf %98, %99 : vector<8x32xf32>
    %101 = arith.addf %90, %100 : vector<8x32xf32>
    %cst_54 = arith.constant dense<0.000000e+00> : vector<8xf32>
    %102 = vector.multi_reduction <add>, %101, %cst_54 [1] : vector<8x32xf32> to vector<8xf32>
    %103 = vector.shape_cast %102 : vector<8xf32> to vector<8x1xf32>
    %cst_55 = arith.constant 3.200000e+01 : f32
    %104 = vector.broadcast %cst_55 : f32 to vector<8x1xf32>
    %105 = arith.divf %103, %104 : vector<8x1xf32>
    %106 = vector.broadcast %105 : vector<8x1xf32> to vector<8x32xf32>
    %107 = arith.subf %101, %106 : vector<8x32xf32>
    %108 = arith.mulf %107, %107 : vector<8x32xf32>
    %cst_56 = arith.constant dense<0.000000e+00> : vector<8xf32>
    %109 = vector.multi_reduction <add>, %108, %cst_56 [1] : vector<8x32xf32> to vector<8xf32>
    %110 = vector.shape_cast %109 : vector<8xf32> to vector<8x1xf32>
    %cst_57 = arith.constant 3.200000e+01 : f32
    %111 = vector.broadcast %cst_57 : f32 to vector<8x1xf32>
    %112 = arith.divf %110, %111 : vector<8x1xf32>
    %113 = vector.broadcast %105 : vector<8x1xf32> to vector<8x32xf32>
    %114 = arith.subf %101, %113 : vector<8x32xf32>
    %cst_58 = arith.constant 9.99999974E-6 : f32
    %115 = vector.broadcast %cst_58 : f32 to vector<8x1xf32>
    %116 = arith.addf %112, %115 : vector<8x1xf32>
    %117 = math.rsqrt %116 : vector<8x1xf32>
    %118 = vector.broadcast %117 : vector<8x1xf32> to vector<8x32xf32>
    %119 = arith.mulf %114, %118 : vector<8x32xf32>
    %120 = vector.broadcast %27 : vector<1x32xf32> to vector<8x32xf32>
    %121 = arith.mulf %119, %120 : vector<8x32xf32>
    %122 = vector.broadcast %29 : vector<1x32xf32> to vector<8x32xf32>
    %123 = arith.addf %121, %122 : vector<8x32xf32>
    %c0_59 = arith.constant 0 : index
    %c0_60 = arith.constant 0 : index
    %124 = vector.load %arg19[%c0_59, %c0_60] : memref<8x32xf32, #tpu.memory_space<vmem>>, vector<8x32xf32>
    tpu.vector_store %arg19[%c0_59, %c0_60], %123 {strides = array<i32>} : memref<8x32xf32, #tpu.memory_space<vmem>>, vector<8x32xf32>,
    %c1_i32 = arith.constant 1 : i32
    %125 = arith.cmpi eq, %arg1, %c1_i32 : i32
    %126 = arith.extui %125 : i1 to i32
    %c0_i32_61 = arith.constant 0 : i32
    %127 = arith.cmpi ne, %126, %c0_i32_61 : i32
    scf.if %127 {
      %c0_62 = arith.constant 0 : index
      %c0_63 = arith.constant 0 : index
      %128 = vector.load %arg16[%c0_62, %c0_63] : memref<32x128xbf16, #tpu.memory_space<vmem>>, vector<32x128xbf16>
      %129 = arith.truncf %123 : vector<8x32xf32> to vector<8x32xbf16>
      %cst_64 = arith.constant dense<0.000000e+00> : vector<8x128xf32>
      %130 = tpu.matmul %129, %128, %cst_64 {dimension_numbers = #tpu.dot_dimension_numbers<[1], [0], [0], [1], [0, 0, 1, 1], [], []>} : vector<8x32xbf16>, vector<32x128xbf16>, vector<8x128xf32> -> vector<8x128xf32>
      %c0_65 = arith.constant 0 : index
      %c0_66 = arith.constant 0 : index
      %131 = vector.load %arg17[%c0_65, %c0_66] : memref<1x128xf32, #tpu.memory_space<vmem>>, vector<1x128xf32>
      %132 = vector.broadcast %131 : vector<1x128xf32> to vector<8x128xf32>
      %133 = arith.addf %130, %132 : vector<8x128xf32>
      %c0_67 = arith.constant 0 : index
      %c0_68 = arith.constant 0 : index
      %c0_69 = arith.constant 0 : index
      %134 = vector.load %arg18[%c0_67, %c0_68, %c0_69] : memref<1x8x128xf32, #tpu.memory_space<vmem>>, vector<1x8x128xf32>
      %135 = vector.shape_cast %134 : vector<1x8x128xf32> to vector<8x128xf32>
      %136 = vector.shape_cast %133 : vector<8x128xf32> to vector<1x8x128xf32>
      tpu.vector_store %arg18[%c0_67, %c0_68, %c0_69], %136 {strides = array<i32>} : memref<1x8x128xf32, #tpu.memory_space<vmem>>, vector<1x8x128xf32>,
    } else {
    }
    return
  }
  func.func @transform_0(%arg0: i32, %arg1: i32) -> (i32, i32, i32) {
    %c0_i32 = arith.constant 0 : i32
    %c0_i32_0 = arith.constant 0 : i32
    %c0_i32_1 = arith.constant 0 : i32
    return %arg0, %c0_i32, %c0_i32_0 : i32, i32, i32
  }
  func.func @transform_1(%arg0: i32, %arg1: i32) -> (i32, i32, i32) {
    %c0_i32 = arith.constant 0 : i32
    %c0_i32_0 = arith.constant 0 : i32
    %c0_i32_1 = arith.constant 0 : i32
    return %arg0, %c0_i32, %c0_i32_0 : i32, i32, i32
  }
  func.func @transform_2(%arg0: i32, %arg1: i32) -> (i32, i32, i32) {
    %c0_i32 = arith.constant 0 : i32
    %c0_i32_0 = arith.constant 0 : i32
    %c0_i32_1 = arith.constant 0 : i32
    return %arg1, %c0_i32, %c0_i32_0 : i32, i32, i32
  }
  func.func @transform_3(%arg0: i32, %arg1: i32) -> (i32, i32, i32) {
    %c0_i32 = arith.constant 0 : i32
    %c0_i32_0 = arith.constant 0 : i32
    %c0_i32_1 = arith.constant 0 : i32
    return %arg1, %c0_i32, %c0_i32_0 : i32, i32, i32
  }
  func.func @transform_4(%arg0: i32, %arg1: i32) -> (i32, i32, i32) {
    %c0_i32 = arith.constant 0 : i32
    %c0_i32_0 = arith.constant 0 : i32
    %c0_i32_1 = arith.constant 0 : i32
    return %arg1, %c0_i32, %c0_i32_0 : i32, i32, i32
  }
  func.func @transform_5(%arg0: i32, %arg1: i32) -> (i32, i32, i32) {
    %c0_i32 = arith.constant 0 : i32
    %c0_i32_0 = arith.constant 0 : i32
    %c0_i32_1 = arith.constant 0 : i32
    return %arg1, %c0_i32, %c0_i32_0 : i32, i32, i32
  }
  func.func @transform_6(%arg0: i32, %arg1: i32) -> (i32, i32, i32) {
    %c0_i32 = arith.constant 0 : i32
    %c0_i32_0 = arith.constant 0 : i32
    %c0_i32_1 = arith.constant 0 : i32
    return %arg1, %c0_i32, %c0_i32_0 : i32, i32, i32
  }
  func.func @transform_7(%arg0: i32, %arg1: i32) -> (i32, i32, i32) {
    %c0_i32 = arith.constant 0 : i32
    %c0_i32_0 = arith.constant 0 : i32
    %c0_i32_1 = arith.constant 0 : i32
    return %arg1, %c0_i32, %c0_i32_0 : i32, i32, i32
  }
  func.func @transform_8(%arg0: i32, %arg1: i32) -> (i32, i32, i32) {
    %c0_i32 = arith.constant 0 : i32
    %c0_i32_0 = arith.constant 0 : i32
    %c0_i32_1 = arith.constant 0 : i32
    return %arg1, %c0_i32, %c0_i32_0 : i32, i32, i32
  }
  func.func @transform_9(%arg0: i32, %arg1: i32) -> (i32, i32, i32) {
    %c0_i32 = arith.constant 0 : i32
    %c0_i32_0 = arith.constant 0 : i32
    %c0_i32_1 = arith.constant 0 : i32
    return %arg1, %c0_i32, %c0_i32_0 : i32, i32, i32
  }
  func.func @transform_10(%arg0: i32, %arg1: i32) -> (i32, i32, i32) {
    %c0_i32 = arith.constant 0 : i32
    %c0_i32_0 = arith.constant 0 : i32
    %c0_i32_1 = arith.constant 0 : i32
    return %arg1, %c0_i32, %c0_i32_0 : i32, i32, i32
  }
  func.func @transform_11(%arg0: i32, %arg1: i32) -> (i32, i32, i32) {
    %c0_i32 = arith.constant 0 : i32
    %c0_i32_0 = arith.constant 0 : i32
    %c0_i32_1 = arith.constant 0 : i32
    return %arg1, %c0_i32, %c0_i32_0 : i32, i32, i32
  }
  func.func @transform_12(%arg0: i32, %arg1: i32) -> (i32, i32, i32) {
    %c0_i32 = arith.constant 0 : i32
    %c0_i32_0 = arith.constant 0 : i32
    %c0_i32_1 = arith.constant 0 : i32
    return %arg1, %c0_i32, %c0_i32_0 : i32, i32, i32
  }
  func.func @transform_13(%arg0: i32, %arg1: i32) -> (i32, i32, i32) {
    %c0_i32 = arith.constant 0 : i32
    %c0_i32_0 = arith.constant 0 : i32
    %c0_i32_1 = arith.constant 0 : i32
    return %arg1, %c0_i32, %c0_i32_0 : i32, i32, i32
  }
  func.func @transform_14(%arg0: i32, %arg1: i32) -> (i32, i32) {
    %c0_i32 = arith.constant 0 : i32
    %c0_i32_0 = arith.constant 0 : i32
    %c0_i32_1 = arith.constant 0 : i32
    return %c0_i32, %c0_i32_0 : i32, i32
  }
  func.func @transform_15(%arg0: i32, %arg1: i32) -> (i32, i32) {
    %c0_i32 = arith.constant 0 : i32
    %c0_i32_0 = arith.constant 0 : i32
    %c0_i32_1 = arith.constant 0 : i32
    return %c0_i32, %c0_i32_0 : i32, i32
  }
  func.func @transform_16(%arg0: i32, %arg1: i32) -> (i32, i32, i32) {
    %c0_i32 = arith.constant 0 : i32
    %c0_i32_0 = arith.constant 0 : i32
    %c0_i32_1 = arith.constant 0 : i32
    return %arg0, %c0_i32, %c0_i32_0 : i32, i32, i32
  }
}

</mosaic_0001>

<bundles_post_ra>
// kernel: hangman_bert_forward.1
= control target key start
LH: loop header
LB: loop body
LE: loop exit
PB: predicated region body
PF: predicated region fallthrough
CT: control target
= control target key end

     0   :  { %s2866_s0 = inlined_call_operand.vmem [shape: bf16[2,8,32], index: 0, kind: input, shape index: {}]   ;;  %s2867_s1 = inlined_call_operand.vmem [shape: f32[2,1,8], index: 1, kind: input, shape index: {}]   ;;  %s2868_s2 = inlined_call_operand.vmem [shape: bf16[2,32,96], index: 2, kind: input, shape index: {}]   ;;  %s2869_s3 = inlined_call_operand.vmem [shape: f32[2,1,96], index: 3, kind: input, shape index: {}]   ;;  %s2870_s4 = inlined_call_operand.vmem [shape: bf16[2,32,32], index: 4, kind: input, shape index: {}]   ;;  %s2871_s5 = inlined_call_operand.vmem [shape: f32[2,1,32], index: 5, kind: input, shape index: {}]   ;;  %s2872_s6 = inlined_call_operand.vmem [shape: f32[2,1,32], index: 6, kind: input, shape index: {}]   ;;  %s2873_s7 = inlined_call_operand.vmem [shape: f32[2,1,32], index: 7, kind: input, shape index: {}]   ;;  %s2874_s8 = inlined_call_operand.vmem [shape: bf16[2,32,128], index: 8, kind: input, shape index: {}]   ;;  %s2875_s9 = inlined_call_operand.vmem [shape: f32[2,1,128], index: 9, kind: input, shape index: {}]   ;;  %s2876_s10 = inlined_call_operand.vmem [shape: bf16[2,128,32], index: 10, kind: input, shape index: {}]   ;;  %s2877_s11 = inlined_call_operand.vmem [shape: f32[2,1,32], index: 11, kind: input, shape index: {}]   ;;  %s2878_s12 = inlined_call_operand.vmem [shape: f32[2,1,32], index: 12, kind: input, shape index: {}]   ;;  %s2879_s13 = inlined_call_operand.vmem [shape: f32[2,1,32], index: 13, kind: input, shape index: {}]   ;;  %s2880_s14 = inlined_call_operand.vmem [shape: bf16[32,128], index: 14, kind: input, shape index: {}]   ;;  %s2881_s15 = inlined_call_operand.vmem [shape: f32[1,128], index: 15, kind: input, shape index: {}]   ;;  %s2882_s16 = inlined_call_operand.hbm [shape: f32[2,8,128], index: 16, kind: output, shape index: {}]  }
   0x1   :  { %2899 = sst [smem:[#allocation19_spill]] %s2866_s0 }
   0x2   :  { %2900 = sst [smem:[#allocation20_spill]] %s2867_s1 }
   0x3   :  { %2901 = sst [smem:[#allocation21_spill]] %s2868_s2 }
   0x4   :  { %2902 = sst [smem:[#allocation22_spill]] %s2869_s3 }
   0x5   :  { %2903 = sst [smem:[#allocation23_spill]] %s2870_s4 }
   0x6   :  { %2904 = sst [smem:[#allocation24_spill]] %s2873_s7 }
   0x7   :  { %2905 = sst [smem:[#allocation25_spill]] %s2874_s8 }
   0x8   :  { %2906 = sst [smem:[#allocation26_spill]] %s2878_s12 }
   0x9   :  { %2907 = sst [smem:[#allocation27_spill]] %s2879_s13 }
   0xa   :  { %2908 = sst [smem:[#allocation28_spill]] %s2880_s14 }
   0xb   :  { %2909 = sst [smem:[#allocation29_spill]] %s2881_s15 }
   0xc   :  { %2910 = sst [smem:[#allocation30_spill]] %s2882_s16 }
   0xd   :  { %21 = vsyncpa [#allocation4], 0 }
   0xe   :  { %23 = vsyncpa [#allocation4 + $0x1], 0  ;;  %s2395_s21 = smov 0   ;;  %s2397_s22 = smov 0  }
   0xf   :  { %s2399_s23 = smov 0   ;;  %s2401_s24 = smov 0  }
  0x10   :  { %s2403_s25 = smov 0   ;;  %s2405_s26 = smov 0  }
  0x11   :  { %s2407_s27 = smov 0   ;;  %s2409_s28 = smov 0  }
  0x12 LB: > { %2911 = sst [smem:[#allocation6_spill]] %s2269_s21  ;;  %s1972_s29 = sadd.s32 4294967295, %s2297_s28   ;;  %s2297_s28 = sphi %s2409_s28, %s29_s28   ;;  %s2293_s27 = sphi %s2407_s27, %s2962_s27   ;;  %s2289_s26 = sphi %s2405_s26, %s2961_s26   ;;  %s2285_s25 = sphi %s2403_s25, %s2960_s25   ;;  %s2281_s24 = sphi %s2401_s24, %s2959_s24   ;;  %s2277_s23 = sphi %s2399_s23, %s2958_s23   ;;  %s2273_s22 = sphi %s2397_s22, %s2957_s22   ;;  %s2269_s21 = sphi %s2395_s21, %s2956_s21  }
  0x13   : > { %2912 = sst [smem:[#allocation7_spill]] %s2273_s22  ;;  %s1973_s30 = sadd.s32 4294967294, %s2297_s28  }
  0x14   : > { %2913 = sst [smem:[#allocation8_spill]] %s2277_s23  ;;  %s38_s0 = sadd.s32 1, %s2289_s26 }
  0x15   : > { %2914 = sst [smem:[#allocation9_spill]] %s2281_s24  ;;  %p39_p0 = scmp.ge.s32.totalorder %s38_s0, 2 }
  0x16   : > { %2915 = sst [smem:[#allocation10_spill]] %s2285_s25  ;;  %s41_s17 = sadd.s32 1, %s2293_s27 }
  0x17   : > { %2916 = sst [smem:[#allocation11_spill]] %s2289_s26  ;;  %p464_p1 = scmp.ne.s32.totalorder %s2277_s23, %s2273_s22 }
  0x18   : > { %2917 = sst [smem:[#allocation12_spill]] %s2293_s27  ;;  %p465_p2 = scmp.eq.s32.totalorder %s1972_s29, 3 }
  0x19   : > { %2918 = sst [smem:[#allocation13_spill]] %s2297_s28  ;;  %s2964_s0 = smov (%p39_p0, %s38_s0), 0 }
  0x1a   : > { %2919 = sst [smem:[#allocation14_spill]] %s2964_s0  ;;  %s2966_s17 = smov (!%p39_p0, %s41_s17), %s2293_s27 }
  0x1b   : > { %p2444_p3 = por %p465_p2, %p464_p1  ;;  %p470_p4 = scmp.ne.s32.totalorder %s2273_s22, %s2269_s21 }
  0x1c   : > { %p43_p5 = scmp.ge.s32.totalorder %s2966_s17, 2  ;;  %p471_p6 = scmp.eq.s32.totalorder %s1973_s30, 3 }
  0x1d   : > { %s2920_s18 = scalar_select %p2444_p3, 1, 0 }
  0x1e   : > { %p1976_p7 = scmp.ge.s32.totalorder %s2297_s28, 1  ;;  %p588_p8 = scmp.lt.s32.totalorder %s2297_s28, 5 }
  0x1f   : > { %2921 = sst [smem:[#allocation15_spill]] %s2920_s18  ;;  %s2968_s17 = smov (%p43_p5, %s2966_s17), 0 }
  0x20   : > { %2922 = sst [smem:[#allocation16_spill]] %s2968_s17  ;;  %p2454_p9 = por %p471_p6, %p470_p4 }
  0x21   : > { %p589_p10 = pnand %p1976_p7, %p588_p8  ;;  %s451_s20 = ssub.s32 %s2293_s27, %s2968_s17 }
  0x22   : > { %s2923_s19 = scalar_select %p2454_p9, 1, 0 }
  0x23   : > { %s454_s29 = sadd.s32 1, %s2277_s23  ;;  %p452_p11 = scmp.eq.s32.totalorder %s451_s20, 0 }
  0x24   : > { %2924 = sst [smem:[#allocation17_spill]] %s2923_s19  ;;  %592 = sbr.rel (%p589_p10) target bundleno = 2243 (0x8c3), region = 84 }
  0x25   : > { %s2462_s0 = scalar_select %p452_p11, %s2277_s23, %s454_s29  }
  0x26   : > { %s2886_s30 = sand.u32 (!%p589_p10), 1, %s2273_s22   ;;  %p684_p12 = scmp.lt.s32.totalorder (!%p589_p10), %s2285_s25, 1 }
  0x27   : > { %2925 = sst [smem:[#allocation18_spill]] %s2462_s0  ;;  %s2468_s26 = sshll.u32 (!%p589_p10), %s2886_s30, 3 }
  0x28   : > { %p691_p13 = scmp.lt.s32.totalorder (!%p589_p10), %s2281_s24, 1  ;;  %s2927_s21 = sld [smem:[#allocation19_spill]] (!%p589_p10) }
  0x29   : > { %s2472_s19 = scalar_select %p684_p12, %s2285_s25, 1 }
  0x2a   : > { %s2475_s20 = scalar_select %p691_p13, %s2281_s24, 1 }
  0x2b   : > { %s1978_s29 = sshll.u32 %s2472_s19, 2  ;;  %s2928_s2 = sld [smem:[#allocation21_spill]] }
  0x2c   : > { %s2069_s16 = sshll.u32 %s2475_s20, 4  ;;  %s2929_s3 = sld [smem:[#allocation22_spill]] }
  0x2d   : > { %s2930_s4 = sld [smem:[#allocation23_spill]]  ;;  %s728_s23 = scalar_lea.vmem %s2877_s11, %s2475_s20 }
  0x2e   : > { %s687_s28 = scalar_lea.vmem %s2927_s21, %s1978_s29  ;;  %s2932_s8 = sld [smem:[#allocation25_spill]] }
  0x2f   : > { %s2933_s18 = sld [smem:[#allocation26_spill]]  ;;  %s683_s12 = scalar_lea.vmem [#allocation3], %s2468_s26 }
  0x30   : > { %s2935_s13 = sld [smem:[#allocation9_spill]] }
  0x31   : > { %s695_s25 = scalar_lea.vmem %s2928_s2, %s2069_s16 }
  0x32   : > { %s698_s24 = scalar_lea.vmem %s2929_s3, %s2475_s20  ;;  %s720_s3 = scalar_lea.vmem %s2875_s9, %s2475_s20 }
  0x33   : > { %s2496_s17 = scalar_lea.vmem %s2930_s4, %s2069_s16  ;;  %s2072_s4 = sshll.u32 %s2475_s20, 6 }
  0x34   : > { %s2513_s15 = scalar_lea.vmem %s2932_s8, %s2069_s16  ;;  %s2527_s29 = scalar_lea.vmem %s2876_s10, %s2072_s4 }
  0x35   : > { %s731_s2 = scalar_lea.vmem %s2933_s18, %s2475_s20  ;;  %s2934_s8 = sld [smem:[#allocation27_spill]] }
  0x36   : > { %p1987_p0 = scmp.ne.s32.totalorder %s2935_s13, 0 }
  0x38   : > { %739 = sbr.rel (%p1987_p0) target bundleno = 65 (0x41), region = 88 }
  0x3b   : > { %s734_s7 = scalar_lea.vmem %s2934_s8, %s2475_s20 }
  0x3d   : > { %v740_v0 = vld [vmem:[%s687_s28] sm:$0xf]  ;;  %vm742_vm0 = vcmask 261120  }
  0x3e   : > { %v741_v1 = vunpack.c.l.bf16 %v740_v0 }
  0x40   : > { %743 = vst.msk [vmem:[#allocation2] sm:$0xff] %vm742_vm0, %v741_v1 }
  0x41 PF: > { %v2074_v2 = vld [vmem:[%s695_s25 + $0x8] sm:$0xff]  ;;  %v2073_v3 = vld [vmem:[%s695_s25] sm:$0xff]  ;;  %vm798_vm1 = vcmask 261120   ;;  %s2299_s4 = smov 104   ;;  %s2300_s8 = smov 120   ;;  %vm846_vm2 = vcmask 1047556  }
  0x42   : > { %808 = vmatpush.bf16.msra.mxu0 %v2074_v2  ;;  %v2171_v6 = vld [vmem:[%s698_s24] ss:$0 sm:$0xff]  ;;  %s2301_s25 = smov 96   ;;  %s2302_s28 = smov 112   ;;  %v2304_v15 = vmov 1983009808  }
  0x43   : > { %s2303_s18 = smov 64   ;;  %v837_v16 = vunpack.c.l.s4 %v2304_v15  ;;  %v2305_v27 = vmov 1934713408   ;;  %vm1185_vm3 = vcmask 64512   ;;  %s2936_s30 = sld [smem:[#allocation20_spill]]  ;;  %vm1313_vm4 = vcmask 1043456  }
  0x44   : > { %v851_v28 = vunpack.c.l.s4 %v2305_v27  ;;  %s2307_s21 = smov 16   ;;  %s2308_s1 = smov 8   ;;  %vm1511_vm5 = vcmask 130048   ;;  %vm1513_vm6 = vcmask 195584  }
  0x45   : > { %v2557_v21 = vunpack.c.0.s8 %v837_v16  ;;  %s2938_s14 = scalar_lea.vmem %s2871_s5, %s2475_s20  ;;  %s2939_s13 = scalar_lea.vmem %s2872_s6, %s2475_s20 }
  0x46   : > { %809 = vmatpush.bf16.msra.mxu0 %v2073_v3  ;;  %v2566_v33 = vunpack.c.0.s8 %v851_v28 }
  0x47   : > { %v2539_v4 = vld [vmem:[#allocation2] sm:$0xff] }
  0x48   : > { %v782_v5 = vpack.c.bf16 %v2539_v4, %v2539_v4 }
  0x49   : > { %s2937_s0 = scalar_lea.vmem %s2936_s30, %s2472_s19  ;;  %s2306_s19 = smov 24  }
  0x4a   : > { %1996 = vmatmul.msk.bf16.vlgmr.msra.gmra.mxu0 %vm798_vm1, %v782_v5 }
  0xc7   : > { %v811_v7 = vpop.f32.mrf.mxu0 }
  0xc8   : > { %v812_v8 = vadd.f32 %v2171_v6, %v811_v7 }
  0xca   : > { %v815_v9 = vpack.c.bf16 %v812_v8, %v812_v8 }
  0xcc   : > { %821 = vrot.lane.b32.xlu1 %v815_v9, %s2299_s4  ;;  %817 = vrot.lane.b32.xlu0 %v815_v9, %s2300_s8  ;;  %v826_v17 = vshrl.u32 %v815_v9, 16 }
  0xcf   : > { %v813_v10 = vpop.f32.mrf.mxu0 }
  0xd4   : > { %888 = vrot.lane.b32.xlu1 %v815_v9, %s2301_s25  ;;  %819 = vrot.lane.b32.xlu0 %v815_v9, %s2302_s28 }
  0xdc   : > { %960 = vrot.lane.b32.xlu1 %v815_v9, %s2303_s18 }
 0x13e   : > { %v2545_v11 = vpop.permute.xlu1 %821  ;;  %v2547_v12 = vpop.permute.xlu0 %817 }
 0x13f   : > { %894 = vrot.lane.b32.xlu0 %v2545_v11, %s2301_s25  ;;  %890 = vrot.lane.b32.xlu2 %v2547_v12, %s2301_s25  ;;  %v827_v14 = vshrl.u32 %v2547_v12, 16  ;;  %v833_v19 = vshrl.u32 %v2545_v11, 16  ;;  %v825_v22 = vpack.i.b16 %v2547_v12, %v815_v9 }
 0x141   : > { %v828_v20 = vpack.i.b16 %v827_v14, %v826_v17  ;;  %v839_v26 = vperm.slane %v825_v22, %v2557_v21 }
 0x143   : > { %v866_v25 = vperm.slane %v828_v20, %v2557_v21  ;;  %v848_v32 = vrot.slane %v839_v26, 4 }
 0x145   : > { %v874_v31 = vrot.slane %v866_v25, 4 }
 0x146   : > { %v2551_v13 = vpop.permute.xlu0 %819  ;;  %v889_v40 = vpop.permute.xlu1 %888 }
 0x147   : > { %892 = vrot.lane.b32.xlu2 %v2551_v13, %s2301_s25  ;;  %v832_v18 = vshrl.u32 %v2551_v13, 16  ;;  %v831_v24 = vpack.i.b16 %v2545_v11, %v2551_v13  ;;  %v899_v45 = vshrl.u32 %v889_v40, 16  ;;  %s2940_s25 = sld [smem:[#allocation24_spill]] }
 0x149   : > { %v834_v23 = vpack.i.b16 %v833_v19, %v832_v18  ;;  %v844_v30 = vperm.slane %v831_v24, %v2557_v21 }
 0x14b   : > { %v871_v29 = vperm.slane %v834_v23, %v2557_v21  ;;  %v845_v37 = vrot.slane %v844_v30, 4  ;;  %v849_v38 = vsel %vm846_vm2, %v844_v30, %v848_v32 }
 0x14c   : > { %v857_v41 = vperm.slane %v849_v38, %v2566_v33 }
 0x14d   : > { %v872_v34 = vrot.slane %v871_v29, 4  ;;  %v875_v35 = vsel %vm846_vm2, %v871_v29, %v874_v31  ;;  %v847_v43 = vsel %vm846_vm2, %v845_v37, %v839_v26  ;;  %s2941_s28 = scalar_lea.vmem %s2940_s25, %s2475_s20 }
 0x14e   : > { %v883_v39 = vperm.slane %v875_v35, %v2566_v33  ;;  %v853_v49 = vperm.slane %v847_v43, %v2566_v33  ;;  %v860_v50 = vrot.slane %v857_v41, 4 }
 0x14f   : > { %v873_v42 = vsel %vm846_vm2, %v872_v34, %v866_v25 }
 0x150   : > { %v879_v46 = vperm.slane %v873_v42, %v2566_v33  ;;  %v886_v47 = vrot.slane %v883_v39, 4  ;;  %v858_v56 = vrot.slane %v853_v49, 4  ;;  %v861_v57 = vsel %vm846_vm2, 0, %v860_v50 }
 0x151   : > { %v1037_v5 = vrot.slane %v861_v57, 4  ;;  %v1032_v42 = vsel %vm846_vm2, %v860_v50, %v853_v49 }
 0x152   : > { %v884_v53 = vrot.slane %v879_v46, 4  ;;  %v887_v54 = vsel %vm846_vm2, 0, %v886_v47  ;;  %v859_v6 = vsel %vm846_vm2, 0, %v858_v56  ;;  %v1051_v39 = vsel %vm846_vm2, %v886_v47, %v879_v46 }
 0x153   : > { %v1056_v63 = vrot.slane %v887_v54, 4  ;;  %v1038_v23 = vsel %vm846_vm2, %v1037_v5, %v859_v6  ;;  %v1055_v54 = vperm.slane %v1051_v39, %v2557_v21  ;;  %v1036_v46 = vperm.slane %v1032_v42, %v2557_v21 }
 0x154   : > { %v885_v3 = vsel %vm846_vm2, 0, %v884_v53  ;;  %v1042_v31 = vperm.slane %v1038_v23, %v2557_v21 }
 0x155   : > { %v1057_v15 = vsel %vm846_vm2, %v1056_v63, %v885_v3 }
 0x156   : > { %v1061_v25 = vperm.slane %v1057_v15, %v2557_v21 }
 0x158   : > { %v1062_v43 = vrot.slane %v1061_v25, 4 }
 0x15a   : > { %v1063_v50 = vsel %vm846_vm2, %v1062_v43, %v1055_v54  ;;  %v961_v54 = vpop.permute.xlu1 %960 }
 0x199   : > { %v891_v36 = vpop.permute.xlu2 %890 }
 0x19a   : > { %v900_v44 = vshrl.u32 %v891_v36, 16  ;;  %v898_v48 = vpack.i.b16 %v891_v36, %v889_v40 }
 0x19c   : > { %v901_v51 = vpack.i.b16 %v900_v44, %v899_v45  ;;  %v912_v55 = vperm.slane %v898_v48, %v2557_v21  ;;  %v1043_v48 = vrot.slane %v1042_v31, 4  ;;  %v2172_v31 = vld [vmem:[%s2937_s0] ss:$0 sm:$0xff] }
 0x19e   : > { %v938_v59 = vperm.slane %v901_v51, %v2557_v21  ;;  %v920_v0 = vrot.slane %v912_v55, 4  ;;  %v1044_v57 = vsel %vm846_vm2, %v1043_v48, %v1036_v46 }
 0x19f   : > { %v1048_v63 = vperm.slane %v1044_v57, %v2566_v33 }
 0x1a0   : > { %v946_v7 = vrot.slane %v938_v59, 4 }
 0x1a1   : > { %v893_v52 = vpop.permute.xlu2 %892 }
 0x1a2   : > { %v905_v60 = vshrl.u32 %v893_v52, 16 }
 0x1b1   : > { %v895_v58 = vpop.permute.xlu0 %894 }
 0x1b2   : > { %v904_v61 = vpack.i.b16 %v895_v58, %v893_v52  ;;  %v906_v62 = vshrl.u32 %v895_v58, 16 }
 0x1b4   : > { %v907_v1 = vpack.i.b16 %v906_v62, %v905_v60  ;;  %v917_v2 = vperm.slane %v904_v61, %v2557_v21  ;;  %v1067_v61 = vperm.slane %v1063_v50, %v2566_v33 }
 0x1b6   : > { %v918_v8 = vrot.slane %v917_v2, 4  ;;  %v921_v9 = vsel %vm846_vm2, %v917_v2, %v920_v0  ;;  %v943_v10 = vperm.slane %v907_v1, %v2557_v21  ;;  %v1072_v23 = vpack.i.b16 %v1067_v61, %v1048_v63 }
 0x1b7   : > { %v929_v14 = vperm.slane %v921_v9, %v2566_v33 }
 0x1b8   : > { %v919_v16 = vsel %vm846_vm2, %v918_v8, %v912_v55  ;;  %v944_v17 = vrot.slane %v943_v10, 4  ;;  %v947_v18 = vsel %vm846_vm2, %v943_v10, %v946_v7  ;;  %v1068_v8 = vrot.slane %v1067_v61, 4 }
 0x1b9   : > { %v925_v19 = vperm.slane %v919_v16, %v2566_v33  ;;  %v932_v20 = vrot.slane %v929_v14, 4  ;;  %v955_v22 = vperm.slane %v947_v18, %v2566_v33  ;;  %v1049_v16 = vrot.slane %v1048_v63, 4 }
 0x1ba   : > { %v945_v24 = vsel %vm846_vm2, %v944_v17, %v938_v59 }
 0x1bb   : > { %v930_v26 = vrot.slane %v925_v19, 4  ;;  %v933_v27 = vsel %vm846_vm2, 0, %v932_v20  ;;  %v951_v28 = vperm.slane %v945_v24, %v2566_v33  ;;  %v958_v29 = vrot.slane %v955_v22, 4 }
 0x1bc   : > { %v1087_v30 = vrot.slane %v933_v27, 4  ;;  %v1082_v37 = vsel %vm846_vm2, %v932_v20, %v925_v19  ;;  %v1074_v19 = vshrl.u32 %v1067_v61, 16  ;;  %v1069_v20 = vsel %vm846_vm2, 0, %v1068_v8 }
 0x1bd   : > { %v931_v32 = vsel %vm846_vm2, 0, %v930_v26  ;;  %v956_v34 = vrot.slane %v951_v28, 4  ;;  %v959_v35 = vsel %vm846_vm2, 0, %v958_v29  ;;  %v1101_v44 = vsel %vm846_vm2, %v958_v29, %v951_v28 }
 0x1be   : > { %v1106_v36 = vrot.slane %v959_v35, 4  ;;  %v1088_v38 = vsel %vm846_vm2, %v1087_v30, %v931_v32  ;;  %v1086_v51 = vperm.slane %v1082_v37, %v2557_v21  ;;  %v1105_v55 = vperm.slane %v1101_v44, %v2557_v21 }
 0x1bf   : > { %v957_v40 = vsel %vm846_vm2, 0, %v956_v34  ;;  %v1092_v41 = vperm.slane %v1088_v38, %v2557_v21  ;;  %v1073_v24 = vshrl.u32 %v1048_v63, 16  ;;  %v1050_v25 = vsel %vm846_vm2, 0, %v1049_v16 }
 0x1c0   : > { %v1107_v45 = vsel %vm846_vm2, %v1106_v36, %v957_v40  ;;  %v1080_v26 = vshrl.u32 %v1069_v20, 16  ;;  %v1078_v28 = vpack.i.b16 %v1069_v20, %v1050_v25  ;;  %v1079_v29 = vshrl.u32 %v1050_v25, 16 }
 0x1c1   : > { %v1093_v52 = vrot.slane %v1092_v41, 4  ;;  %v1111_v53 = vperm.slane %v1107_v45, %v2557_v21  ;;  %v1075_v27 = vpack.i.b16 %v1074_v19, %v1073_v24 }
 0x1c2   : > { %v1081_v30 = vpack.i.b16 %v1080_v26, %v1079_v29 }
 0x1c3   : > { %v1094_v47 = vsel %vm846_vm2, %v1093_v52, %v1086_v51  ;;  %v1112_v49 = vrot.slane %v1111_v53, 4 }
 0x1c4   : > { %v1098_v56 = vperm.slane %v1094_v47, %v2566_v33 }
 0x1c5   : > { %v1113_v58 = vsel %vm846_vm2, %v1112_v49, %v1105_v55 }
 0x1c6   : > { %v1117_v59 = vperm.slane %v1113_v58, %v2566_v33  ;;  %v1099_v60 = vrot.slane %v1098_v56, 4  ;;  %v1123_v62 = vshrl.u32 %v1098_v56, 16 }
 0x1c8   : > { %v1122_v0 = vpack.i.b16 %v1117_v59, %v1098_v56  ;;  %v1124_v1 = vshrl.u32 %v1117_v59, 16  ;;  %v1100_v2 = vsel %vm846_vm2, 0, %v1099_v60  ;;  %v1118_v3 = vrot.slane %v1117_v59, 4 }
 0x1c9   : > { %v1129_v10 = vshrl.u32 %v1100_v2, 16 }
 0x1ca   : > { %v1190_v5 = vsel %vm1185_vm3, %v1122_v0, 0  ;;  %v1125_v6 = vpack.i.b16 %v1124_v1, %v1123_v62  ;;  %v1119_v7 = vsel %vm846_vm2, 0, %v1118_v3 }
 0x1cb   : > { %1199 = vmatpush.bf16.xpose.msra.mxu1 %v1190_v5  ;;  %v1128_v9 = vpack.i.b16 %v1119_v7, %v1100_v2  ;;  %v1130_v14 = vshrl.u32 %v1119_v7, 16  ;;  %v971_v5 = vshrl.u32 %v961_v54, 16 }
 0x1cc   : > { %v1209_v15 = vsel %vm1185_vm3, %v1125_v6, 0 }
 0x1cd   : > { %1218 = vmatpush.bf16.xpose.msra.mxu2 %v1209_v15  ;;  %v1228_v17 = vsel %vm1185_vm3, %v1128_v9, 0  ;;  %v1131_v18 = vpack.i.b16 %v1130_v14, %v1129_v10 }
 0x1ce   : > { %1237 = vmatpush.bf16.xpose.msra.mxu3 %v1228_v17 }
 0x1cf   : > { %v1247_v22 = vsel %vm1185_vm3, %v1131_v18, 0 }
 0x1d0   : > { %1256 = vmatpush.bf16.xpose.msrb.mxu0 %v1247_v22 }
 0x1d2   : > { %1997 = vmatmul.msk.bf16.vlgmr.msra.gmra.mxu1 %vm1185_vm3, %v1072_v23 }
 0x1d4   : > { %1998 = vmatmul.msk.bf16.vlgmr.msra.gmra.mxu2 %vm1185_vm3, %v1075_v27 }
 0x1d5   : > { %1999 = vmatmul.msk.bf16.vlgmr.msra.gmra.mxu3 %vm1185_vm3, %v1078_v28 }
 0x1d7   : > { %2000 = vmatmul.msk.bf16.vlgmr.msrb.gmra.mxu0 %vm1185_vm3, %v1081_v30 }
 0x24f   : > { %v1201_v32 = vpop.f32.mrf.mxu1 }
 0x250   : > { %v1202_v34 = vadd.f32 %v2172_v31, %v1201_v32 }
 0x252   : > { %v1262_v35 = vsel %vm1185_vm3, %v1202_v34, -inf }
 0x253   : > { %1263 = vmax.xlane.f32.xlu0 %v1262_v35 }
 0x254   : > { %v1258_v36 = vpop.f32.mrf.mxu0 }
 0x255   : > { %v1259_v37 = vadd.f32 %v2172_v31, %v1258_v36 }
 0x257   : > { %v1203_v38 = vpop.f32.mrf.mxu1  ;;  %v1220_v39 = vpop.f32.mrf.mxu2  ;;  %v1271_v40 = vsel %vm1185_vm3, %v1259_v37, -inf }
 0x258   : > { %1272 = vmax.xlane.f32.xlu2 %v1271_v40  ;;  %v1239_v41 = vpop.f32.mrf.mxu3  ;;  %v1221_v43 = vadd.f32 %v2172_v31, %v1220_v39 }
 0x259   : > { %v1240_v42 = vadd.f32 %v2172_v31, %v1239_v41 }
 0x25a   : > { %v1265_v51 = vsel %vm1185_vm3, %v1221_v43, -inf }
 0x25b   : > { %v1268_v44 = vsel %vm1185_vm3, %v1240_v42, -inf }
 0x25c   : > { %v1260_v45 = vpop.f32.mrf.mxu0  ;;  %1269 = vmax.xlane.f32.xlu1 %v1268_v44 }
 0x25f   : > { %v1222_v48 = vpop.f32.mrf.mxu2 }
 0x260   : > { %1266 = vmax.xlane.f32.xlu2 %v1265_v51  ;;  %v1241_v52 = vpop.f32.mrf.mxu3 }
 0x267   : > { %964 = vrot.lane.b32.xlu0 %v2551_v13, %s2303_s18 }
 0x275   : > { %966 = vrot.lane.b32.xlu1 %v2545_v11, %s2303_s18 }
 0x278   : > { %962 = vrot.lane.b32.xlu2 %v2547_v12, %s2303_s18 }
 0x2c6   : > { %v1264_v53 = vpop.xlane.xlu0 %1263 }
 0x2c7   : > { %v1274_v46 = vsub.f32 %v1202_v34, %v1264_v53 }
 0x2c9   : > { %v1278_v47 = vmul.f32 1.442695, %v1274_v46 }
 0x2cb   : > { %2180 = vpow2.f32 %v1278_v47  ;;  %v1273_v55 = vpop.xlane.xlu2 %1272 }
 0x2cc   : > { %v1277_v57 = vsub.f32 %v1259_v37, %v1273_v55 }
 0x2ce   : > { %v1284_v12 = vmul.f32 1.442695, %v1277_v57 }
 0x2cf   : > { %v1270_v49 = vpop.xlane.xlu1 %1269 }
 0x2d0   : > { %v1276_v50 = vsub.f32 %v1240_v42, %v1270_v49 }
 0x2d1   : > { %v2647_v56 = vpop.eup %2180 }
 0x2d2   : > { %v1282_v58 = vmul.f32 1.442695, %v1276_v50  ;;  %v1286_v13 = vsel %vm1185_vm3, %v2647_v56, 0.0 }
 0x2d3   : > { %v1267_v59 = vpop.xlane.xlu2 %1266  ;;  %1287 = vadd.xlane.f32.xlu1 %v1286_v13 }
 0x2d4   : > { %2182 = vpow2.f32 %v1282_v58  ;;  %v1275_v11 = vsub.f32 %v1221_v43, %v1267_v59 }
 0x2d6   : > { %v1280_v60 = vmul.f32 1.442695, %v1275_v11 }
 0x2d8   : > { %2184 = vpow2.f32 %v1280_v60 }
 0x2d9   : > { %2186 = vpow2.f32 %v1284_v12  ;;  %v965_v9 = vpop.permute.xlu0 %964 }
 0x2da   : > { %v2651_v61 = vpop.eup %2182  ;;  %v977_v15 = vshrl.u32 %v965_v9, 16 }
 0x2db   : > { %v1292_v62 = vsel %vm1185_vm3, %v2651_v61, 0.0  ;;  %v963_v63 = vpop.permute.xlu2 %962 }
 0x2dc   : > { %1293 = vadd.xlane.f32.xlu0 %v1292_v62  ;;  %v972_v3 = vshrl.u32 %v963_v63, 16  ;;  %v970_v6 = vpack.i.b16 %v963_v63, %v961_v54 }
 0x2de   : > { %v2655_v0 = vpop.eup %2184  ;;  %v973_v8 = vpack.i.b16 %v972_v3, %v971_v5  ;;  %v984_v10 = vperm.slane %v970_v6, %v2557_v21 }
 0x2df   : > { %v1289_v1 = vsel %vm1185_vm3, %v2655_v0, 0.0  ;;  %v2659_v2 = vpop.eup %2186 }
 0x2e0   : > { %1290 = vadd.xlane.f32.xlu2 %v1289_v1  ;;  %v1295_v7 = vsel %vm1185_vm3, %v2659_v2, 0.0  ;;  %v1010_v16 = vperm.slane %v973_v8, %v2557_v21  ;;  %v992_v19 = vrot.slane %v984_v10, 4 }
 0x2e2   : > { %v1018_v23 = vrot.slane %v1010_v16, 4 }
 0x2e4   : > { %1296 = vadd.xlane.f32.xlu0 %v1295_v7 }
 0x2e7   : > { %v967_v14 = vpop.permute.xlu1 %966 }
 0x2e8   : > { %v976_v17 = vpack.i.b16 %v967_v14, %v965_v9  ;;  %v978_v18 = vshrl.u32 %v967_v14, 16 }
 0x2ea   : > { %v979_v20 = vpack.i.b16 %v978_v18, %v977_v15  ;;  %v989_v22 = vperm.slane %v976_v17, %v2557_v21 }
 0x2ec   : > { %v990_v24 = vrot.slane %v989_v22, 4  ;;  %v993_v25 = vsel %vm846_vm2, %v989_v22, %v992_v19  ;;  %v1015_v26 = vperm.slane %v979_v20, %v2557_v21 }
 0x2ed   : > { %v1001_v27 = vperm.slane %v993_v25, %v2566_v33 }
 0x2ee   : > { %v991_v28 = vsel %vm846_vm2, %v990_v24, %v984_v10  ;;  %v1016_v29 = vrot.slane %v1015_v26, 4  ;;  %v1019_v30 = vsel %vm846_vm2, %v1015_v26, %v1018_v23 }
 0x2ef   : > { %v997_v31 = vperm.slane %v991_v28, %v2566_v33  ;;  %v1004_v32 = vrot.slane %v1001_v27, 4  ;;  %v1027_v34 = vperm.slane %v1019_v30, %v2566_v33 }
 0x2f0   : > { %v1017_v35 = vsel %vm846_vm2, %v1016_v29, %v1010_v16 }
 0x2f1   : > { %v1002_v36 = vrot.slane %v997_v31, 4  ;;  %v1005_v37 = vsel %vm846_vm2, 0, %v1004_v32  ;;  %v1023_v38 = vperm.slane %v1017_v35, %v2566_v33  ;;  %v1030_v39 = vrot.slane %v1027_v34, 4 }
 0x2f2   : > { %v1137_v40 = vrot.slane %v1005_v37, 4  ;;  %v1132_v45 = vsel %vm846_vm2, %v1004_v32, %v997_v31 }
 0x2f3   : > { %v1003_v41 = vsel %vm846_vm2, 0, %v1002_v36  ;;  %v1028_v42 = vrot.slane %v1023_v38, 4  ;;  %v1031_v43 = vsel %vm846_vm2, 0, %v1030_v39  ;;  %v1151_v53 = vsel %vm846_vm2, %v1030_v39, %v1023_v38 }
 0x2f4   : > { %v1156_v44 = vrot.slane %v1031_v43, 4  ;;  %v1138_v48 = vsel %vm846_vm2, %v1137_v40, %v1003_v41  ;;  %v1136_v46 = vperm.slane %v1132_v45, %v2557_v21  ;;  %v1155_v50 = vperm.slane %v1151_v53, %v2557_v21 }
 0x2f5   : > { %v1029_v51 = vsel %vm846_vm2, 0, %v1028_v42  ;;  %v1142_v52 = vperm.slane %v1138_v48, %v2557_v21 }
 0x2f6   : > { %v1157_v54 = vsel %vm846_vm2, %v1156_v44, %v1029_v51 }
 0x2f7   : > { %v1143_v47 = vrot.slane %v1142_v52, 4  ;;  %v1161_v55 = vperm.slane %v1157_v54, %v2557_v21 }
 0x2f9   : > { %v1144_v49 = vsel %vm846_vm2, %v1143_v47, %v1136_v46  ;;  %v1162_v57 = vrot.slane %v1161_v55, 4 }
 0x2fa   : > { %v1148_v58 = vperm.slane %v1144_v49, %v2566_v33 }
 0x2fb   : > { %v1163_v13 = vsel %vm846_vm2, %v1162_v57, %v1155_v50 }
 0x2fc   : > { %v1167_v59 = vperm.slane %v1163_v13, %v2566_v33  ;;  %v1149_v11 = vrot.slane %v1148_v58, 4  ;;  %v1173_v12 = vshrl.u32 %v1148_v58, 16 }
 0x2fe   : > { %v1172_v60 = vpack.i.b16 %v1167_v59, %v1148_v58  ;;  %v1174_v62 = vshrl.u32 %v1167_v59, 16  ;;  %v1150_v63 = vsel %vm846_vm2, 0, %v1149_v11  ;;  %v1168_v1 = vrot.slane %v1167_v59, 4 }
 0x2ff   : > { %v1179_v8 = vshrl.u32 %v1150_v63, 16 }
 0x300   : > { %v1315_v3 = vsel %vm1313_vm4, %v1172_v60, 0  ;;  %v1175_v5 = vpack.i.b16 %v1174_v62, %v1173_v12  ;;  %v1169_v6 = vsel %vm846_vm2, 0, %v1168_v1 }
 0x301   : > { %1324 = vmatpush.bf16.msrb.mxu1 %v1315_v3  ;;  %v1178_v7 = vpack.i.b16 %v1169_v6, %v1150_v63  ;;  %v1180_v9 = vshrl.u32 %v1169_v6, 16 }
 0x302   : > { %v1334_v10 = vsel %vm1313_vm4, %v1175_v5, 0 }
 0x303   : > { %1343 = vmatpush.bf16.msrb.mxu2 %v1334_v10  ;;  %v1353_v14 = vsel %vm1313_vm4, %v1178_v7, 0  ;;  %v1181_v15 = vpack.i.b16 %v1180_v9, %v1179_v8 }
 0x304   : > { %1362 = vmatpush.bf16.msrb.mxu3 %v1353_v14 }
 0x305   : > { %v1372_v16 = vsel %vm1313_vm4, %v1181_v15, 0 }
 0x306   : > { %1381 = vmatpush.bf16.msra.mxu0 %v1372_v16 }
 0x346   : > { %v1288_v17 = vpop.xlane.xlu1 %1287 }
 0x347   : > { %2188 = vrcp.f32 %v1288_v17 }
 0x34d   : > { %v2189_v18 = vpop.eup %2188 }
 0x34e   : > { %v1302_v19 = vmul.f32 %v2189_v18, %v2647_v56 }
 0x34f   : > { %v1294_v20 = vpop.xlane.xlu0 %1293 }
 0x350   : > { %2190 = vrcp.f32 %v1294_v20  ;;  %v1306_v22 = vpack.c.bf16 %v1302_v19, %v1302_v19 }
 0x352   : > { %2001 = vmatmul.msk.bf16.vlgmr.msrb.gmra.mxu1 %vm1185_vm3, %v1306_v22 }
 0x353   : > { %v1291_v23 = vpop.xlane.xlu2 %1290 }
 0x354   : > { %2192 = vrcp.f32 %v1291_v23 }
 0x356   : > { %v2191_v24 = vpop.eup %2190 }
 0x357   : > { %v1304_v25 = vmul.f32 %v2191_v24, %v2651_v61  ;;  %v1297_v26 = vpop.xlane.xlu0 %1296 }
 0x358   : > { %2194 = vrcp.f32 %v1297_v26 }
 0x359   : > { %v1308_v27 = vpack.c.bf16 %v1304_v25, %v1304_v25 }
 0x35a   : > { %v2193_v28 = vpop.eup %2192 }
 0x35b   : > { %v1303_v29 = vmul.f32 %v2193_v28, %v2655_v0  ;;  %2003 = vmatmul.msk.bf16.vlgmr.msrb.gmra.mxu3 %vm1185_vm3, %v1308_v27 }
 0x35d   : > { %v1307_v30 = vpack.c.bf16 %v1303_v29, %v1303_v29 }
 0x35e   : > { %v2195_v56 = vpop.eup %2194 }
 0x35f   : > { %v1305_v31 = vmul.f32 %v2195_v56, %v2659_v2  ;;  %2002 = vmatmul.msk.bf16.vlgmr.msrb.gmra.mxu2 %vm1185_vm3, %v1307_v30 }
 0x361   : > { %v1309_v32 = vpack.c.bf16 %v1305_v31, %v1305_v31 }
 0x363   : > { %2004 = vmatmul.msk.bf16.vlgmr.msra.gmra.mxu0 %vm1185_vm3, %v1309_v32 }
 0x3cf   : > { %v1326_v34 = vpop.f32.mrf.mxu1 }
 0x3d0   : > { %v1390_v61 = vrot.slane %v1326_v34, 4 }
 0x3d7   : > { %v1328_v35 = vpop.f32.mrf.mxu1 }
 0x3de   : > { %v1364_v36 = vpop.f32.mrf.mxu3 }
 0x3df   : > { %v1387_v37 = vrot.slane %v1364_v36, 4  ;;  %v1391_v38 = vsel %vm846_vm2, %v1364_v36, %v1390_v61 }
 0x3e0   : > { %v1383_v39 = vpop.f32.mrf.mxu0  ;;  %v1399_v2 = vperm.slane %v1391_v38, %v2557_v21 }
 0x3e1   : > { %v1389_v0 = vsel %vm846_vm2, %v1387_v37, %v1326_v34  ;;  %v1400_v40 = vrot.slane %v1383_v39, 4 }
 0x3e2   : > { %v1395_v41 = vperm.slane %v1389_v0, %v2557_v21  ;;  %v1345_v42 = vpop.f32.mrf.mxu2  ;;  %v1426_v52 = vrot.slane %v1399_v2, 4 }
 0x3e3   : > { %v1401_v43 = vsel %vm846_vm2, %v1400_v40, %v1345_v42  ;;  %v1402_v44 = vrot.slane %v1345_v42, 4  ;;  %v2076_v40 = vld [vmem:[%s2496_s17 + $0x8] sm:$0xff] }
 0x3e4   : > { %v1414_v45 = vrot.slane %v1395_v41, 4  ;;  %v1407_v48 = vperm.slane %v1401_v43, %v2557_v21  ;;  %1540 = vmatpush.bf16.msra.mxu1 %v2076_v40 }
 0x3e5   : > { %v1403_v51 = vsel %vm846_vm2, %v1383_v39, %v1402_v44 }
 0x3e6   : > { %v1411_v53 = vperm.slane %v1403_v51, %v2557_v21  ;;  %v1412_v54 = vrot.slane %v1407_v48, 4  ;;  %v1415_v46 = vsel %vm846_vm2, %v1407_v48, %v1414_v45  ;;  %v1366_v47 = vpop.f32.mrf.mxu3  ;;  %v2173_v51 = vld [vmem:[%s2938_s14] ss:$0 sm:$0xff] }
 0x3e7   : > { %v1423_v55 = vperm.slane %v1415_v46, %v2566_v33 }
 0x3e8   : > { %v1413_v49 = vsel %vm846_vm2, %v1412_v54, %v1395_v41  ;;  %v1424_v50 = vrot.slane %v1411_v53, 4  ;;  %v1427_v57 = vsel %vm846_vm2, %v1411_v53, %v1426_v52  ;;  %v1385_v58 = vpop.f32.mrf.mxu0  ;;  %v2075_v41 = vld [vmem:[%s2496_s17] sm:$0xff] }
 0x3e9   : > { %v1419_v13 = vperm.slane %v1413_v49, %v2566_v33  ;;  %v1435_v59 = vperm.slane %v1427_v57, %v2566_v33  ;;  %v1438_v11 = vrot.slane %v1423_v55, 4  ;;  %1541 = vmatpush.bf16.msra.mxu1 %v2075_v41  ;;  %v2309_v55 = vmov 32.0  }
 0x3ea   : > { %v1425_v12 = vsel %vm846_vm2, %v1424_v50, %v1399_v2  ;;  %v1347_v60 = vpop.f32.mrf.mxu2  ;;  %2196 = vrcp.f32 %v2309_v55  ;;  %v2178_v55 = vld [vmem:[%s731_s2] ss:$0 sm:$0xff] }
 0x3eb   : > { %v1431_v62 = vperm.slane %v1425_v12, %v2566_v33  ;;  %v1436_v63 = vrot.slane %v1419_v13, 4  ;;  %v1439_v1 = vsel %vm846_vm2, 0.0, %v1438_v11  ;;  %v1442_v3 = vrot.slane %v1435_v59, 4 }
 0x3ec   : > { %v1444_v5 = vsel %vm846_vm2, %v1438_v11, %v1419_v13  ;;  %v1449_v6 = vrot.slane %v1439_v1, 4  ;;  %v2077_v1 = vld [vmem:[%s2513_s15] sm:$0xff] }
 0x3ed   : > { %v1437_v7 = vsel %vm846_vm2, 0.0, %v1436_v63  ;;  %v1440_v8 = vrot.slane %v1431_v62, 4  ;;  %v1443_v9 = vsel %vm846_vm2, 0.0, %v1442_v3  ;;  %v1448_v10 = vperm.slane %v1444_v5, %v2557_v21  ;;  %v2078_v63 = vld [vmem:[%s2513_s15 + $0x8] sm:$0xff] }
 0x3ee   : > { %v1460_v14 = vrot.slane %v1443_v9, 4  ;;  %v1450_v15 = vsel %vm846_vm2, %v1449_v6, %v1437_v7  ;;  %v1455_v16 = vsel %vm846_vm2, %v1442_v3, %v1431_v62  ;;  %1610 = vmatpush.bf16.msra.mxu2 %v2078_v63  ;;  %v2086_v3 = vld [vmem:[%s2527_s29 + $0x38] sm:$0xff]  ;;  %v2085_v7 = vld [vmem:[%s2527_s29 + $0x30] sm:$0xff]  ;;  %v2084_v9 = vld [vmem:[%s2527_s29 + $0x28] sm:$0xff] }
 0x3ef   : > { %v1441_v17 = vsel %vm846_vm2, 0.0, %v1440_v8  ;;  %v1454_v18 = vperm.slane %v1450_v15, %v2557_v21  ;;  %v1459_v19 = vperm.slane %v1455_v16, %v2557_v21  ;;  %v1468_v20 = vrot.slane %v1448_v10, 4  ;;  %1670 = vmatpush.bf16.msra.mxu3 %v2086_v3  ;;  %v2082_v16 = vld [vmem:[%s2527_s29 + $0x18] sm:$0xff] }
 0x3f0   : > { %v1461_v22 = vsel %vm846_vm2, %v1460_v14, %v1441_v17  ;;  %v2197_v49 = vpop.eup %2196 }
 0x3f1   : > { %v1465_v23 = vperm.slane %v1461_v22, %v2557_v21  ;;  %v1469_v24 = vsel %vm846_vm2, %v1454_v18, %v1468_v20  ;;  %v1480_v25 = vrot.slane %v1459_v19, 4  ;;  %v1466_v26 = vrot.slane %v1454_v18, 4 }
 0x3f2   : > { %v1477_v27 = vperm.slane %v1469_v24, %v2566_v33  ;;  %v1552_v50 = vmul.f32 32.0, %v2197_v49  ;;  %vm1556_vm7 = vweird.f32 %v2197_v49  ;;  %1611 = vmatpush.bf16.msra.mxu2 %v2077_v1 }
 0x3f3   : > { %v1481_v28 = vsel %vm846_vm2, %v1465_v23, %v1480_v25  ;;  %v1467_v29 = vsel %vm846_vm2, %v1466_v26, %v1448_v10  ;;  %v1478_v30 = vrot.slane %v1465_v23, 4  ;;  %1671 = vmatpush.bf16.msra.mxu3 %v2085_v7  ;;  %v2083_v10 = vld [vmem:[%s2527_s29 + $0x20] sm:$0xff] }
 0x3f4   : > { %v1489_v56 = vperm.slane %v1481_v28, %v2566_v33  ;;  %v1496_v31 = vrot.slane %v1477_v27, 4  ;;  %v1473_v32 = vperm.slane %v1467_v29, %v2566_v33  ;;  %v1553_v57 = vsub.f32 1.0, %v1552_v50  ;;  %v2174_v23 = vld [vmem:[%s2939_s13] ss:$0 sm:$0xff] }
 0x3f5   : > { %v1479_v34 = vsel %vm846_vm2, %v1478_v30, %v1459_v19  ;;  %v2081_v19 = vld [vmem:[%s2527_s29 + $0x10] sm:$0xff]  ;;  %v2175_v25 = vld [vmem:[%s2941_s28] ss:$0 sm:$0xff]  ;;  %v2080_v30 = vld [vmem:[%s2527_s29 + $0x8] sm:$0xff] }
 0x3f6   : > { %v1497_v21 = vsel %vm846_vm2, %v1489_v56, %v1496_v31  ;;  %v1494_v35 = vrot.slane %v1489_v56, 4  ;;  %v1485_v61 = vperm.slane %v1479_v34, %v2566_v33  ;;  %v1492_v36 = vrot.slane %v1473_v32, 4  ;;  %v2079_v56 = vld [vmem:[%s2527_s29] sm:$0xff] }
 0x3f7   : > { %1507 = vrot.lane.b32.xlu0 %v1497_v21, %s2306_s19  ;;  %v1554_v58 = vmul.f32 %v2197_v49, %v1553_v57  ;;  %1672 = vmatpush.bf16.msra.mxu3 %v2084_v9  ;;  %v2176_v31 = vld [vmem:[%s720_s3] ss:$0 sm:$0xff] }
 0x3f8   : > { %v1495_v37 = vsel %vm846_vm2, %v1494_v35, %v1477_v27  ;;  %v1490_v38 = vrot.slane %v1485_v61, 4  ;;  %v1493_v39 = vsel %vm846_vm2, %v1485_v61, %v1492_v36  ;;  %v2177_v36 = vld [vmem:[%s728_s23] ss:$0 sm:$0xff] }
 0x3f9   : > { %1503 = vrot.lane.b32.xlu1 %v1495_v37, %s2307_s21  ;;  %1499 = vrot.lane.b32.xlu2 %v1493_v39, %s2308_s1  ;;  %v1555_v13 = vadd.f32 %v2197_v49, %v1554_v58  ;;  %v2179_v50 = vld [vmem:[%s734_s7] ss:$0 sm:$0xff]  ;;  %s2944_s1 = sld [smem:[#allocation9_spill]] }
 0x3fa   : > { %v1491_v0 = vsel %vm846_vm2, %v1490_v38, %v1473_v32 }
 0x3fb   : > { %v2756_v59 = vsel %vm1556_vm7, %v2197_v49, %v1555_v13  ;;  %1673 = vmatpush.bf16.msra.mxu3 %v2083_v10 }
 0x3ff   : > { %1674 = vmatpush.bf16.msra.mxu3 %v2082_v16  ;;  %p2055_p1 = scmp.ne.s32.totalorder %s2944_s1, 1 }
 0x400   : > { %s2945_s14 = sld [smem:[#allocation28_spill]] (!%p2055_p1) }
 0x401   : > { %s2946_s15 = sld [smem:[#allocation29_spill]] (!%p2055_p1) }
 0x403   : > { %1675 = vmatpush.bf16.msra.mxu3 %v2081_v19 }
 0x407   : > { %1676 = vmatpush.bf16.msra.mxu3 %v2080_v30 }
 0x40b   : > { %1677 = vmatpush.bf16.msra.mxu3 %v2079_v56 }
 0x453   : > { %v1500_v33 = vpop.permute.xlu2 %1499 }
 0x454   : > { %v1510_v2 = vsel %vm1185_vm3, %v1491_v0, %v1500_v33 }
 0x469   : > { %v1508_v43 = vpop.permute.xlu0 %1507 }
 0x46b   : > { %v1504_v42 = vpop.permute.xlu1 %1503 }
 0x46c   : > { %v1512_v44 = vsel %vm1511_vm5, %v1510_v2, %v1504_v42 }
 0x46d   : > { %v1514_v45 = vsel %vm1513_vm6, %v1512_v44, %v1508_v43 }
 0x46e   : > { %v1515_v48 = vpack.c.bf16 %v1514_v45, %v1514_v45 }
 0x470   : > { %2013 = vmatmul.msk.bf16.vlgmr.msra.gmra.mxu1 %vm798_vm1, %v1515_v48 }
 0x4ed   : > { %v1543_v52 = vpop.f32.mrf.mxu1 }
 0x4ee   : > { %v1544_v53 = vadd.f32 %v2173_v51, %v1543_v52 }
 0x4f0   : > { %v1547_v54 = vadd.f32 %v1544_v53, %v2539_v4 }
 0x4f2   : > { %v1548_v46 = vsel %vm798_vm1, %v1547_v54, 0.0 }
 0x4f3   : > { %1549 = vadd.xlane.f32.xlu2 %v1548_v46 }
 0x4f5   : > { %v1545_v47 = vpop.f32.mrf.mxu1 }
 0x566   : > { %v1550_v11 = vpop.xlane.xlu2 %1549 }
 0x567   : > { %v1558_v4 = vmul.f32 %v2756_v59, %v1550_v11 }
 0x569   : > { %v1559_v12 = vsub.f32 %v1547_v54, %v1558_v4 }
 0x56b   : > { %v1560_v60 = vmul.f32 %v1559_v12, %v1559_v12 }
 0x56d   : > { %v1561_v62 = vsel %vm798_vm1, %v1560_v60, 0.0 }
 0x56e   : > { %1562 = vadd.xlane.f32.xlu0 %v1561_v62 }
 0x5e1   : > { %v1563_v5 = vpop.xlane.xlu0 %1562 }
 0x5e2   : > { %v1564_v6 = vmul.f32 %v1563_v5, %v2756_v59 }
 0x5e4   : > { %v1565_v8 = vadd.f32 1e-05, %v1564_v6 }
 0x5e6   : > { %2198 = vrsqrt.f32 %v1565_v8  ;;  %vm1572_vm9 = vweird.f32 %v1565_v8 }
 0x5ec   : > { %v2199_v14 = vpop.eup %2198 }
 0x5ed   : > { %v1567_v15 = vmul.f32 %v2199_v14, %v1565_v8  ;;  %vm1573_vm8 = vweird.f32 %v2199_v14 }
 0x5ee   : > { %vm1574_vm10 = vmor %vm1572_vm9, %vm1573_vm8 }
 0x5ef   : > { %v1568_v17 = vmul.f32 %v2199_v14, %v1567_v15 }
 0x5f1   : > { %v1569_v18 = vmul.f32 0.5, %v1568_v17 }
 0x5f3   : > { %v1570_v20 = vsub.f32 1.5, %v1569_v18 }
 0x5f5   : > { %v1571_v22 = vmul.f32 %v2199_v14, %v1570_v20 }
 0x5f7   : > { %v1575_v24 = vsel %vm1574_vm10, %v2199_v14, %v1571_v22 }
 0x5f8   : > { %v1576_v26 = vmul.f32 %v1575_v24, %v1559_v12 }
 0x5fa   : > { %v1580_v27 = vmul.f32 %v2174_v23, %v1576_v26 }
 0x5fc   : > { %v1584_v28 = vadd.f32 %v2175_v25, %v1580_v27 }
 0x5fe   : > { %v1585_v29 = vpack.c.bf16 %v1584_v28, %v1584_v28 }
 0x600   : > { %2022 = vmatmul.msk.bf16.vlgmr.msra.gmra.mxu2 %vm798_vm1, %v1585_v29 }
 0x683   : > { %v1613_v32 = vpop.f32.mrf.mxu2 }
 0x684   : > { %v1614_v34 = vadd.f32 %v2176_v31, %v1613_v32 }
 0x686   : > { %v1617_v21 = vmax.f32 %v1614_v34, 0.0 }
 0x688   : > { %v1618_v35 = vpack.c.bf16 %v1617_v21, %v1617_v21 }
 0x68a   : > { %1678 = vmatmul.bf16.vlgmr.msra.gmra.mxu3 %v1618_v35 }
 0x68b   : > { %v1615_v61 = vpop.f32.mrf.mxu2 }
 0x70d   : > { %v1679_v37 = vpop.f32.mrf.mxu3 }
 0x70e   : > { %v1680_v38 = vadd.f32 %v2177_v36, %v1679_v37 }
 0x710   : > { %v1683_v39 = vadd.f32 %v1680_v38, %v1584_v28 }
 0x712   : > { %v1684_v0 = vsel %vm798_vm1, %v1683_v39, 0.0 }
 0x713   : > { %1685 = vadd.xlane.f32.xlu1 %v1684_v0 }
 0x715   : > { %v1681_v40 = vpop.f32.mrf.mxu3 }
 0x786   : > { %v1686_v41 = vpop.xlane.xlu1 %1685 }
 0x787   : > { %v1687_v33 = vmul.f32 %v1686_v41, %v2756_v59 }
 0x789   : > { %v1688_v2 = vsub.f32 %v1683_v39, %v1687_v33 }
 0x78b   : > { %v1689_v42 = vmul.f32 %v1688_v2, %v1688_v2 }
 0x78d   : > { %v1690_v43 = vsel %vm798_vm1, %v1689_v42, 0.0 }
 0x78e   : > { %1691 = vadd.xlane.f32.xlu2 %v1690_v43 }
 0x801   : > { %v1692_v44 = vpop.xlane.xlu2 %1691 }
 0x802   : > { %v1693_v45 = vmul.f32 %v1692_v44, %v2756_v59 }
 0x804   : > { %v1694_v48 = vadd.f32 1e-05, %v1693_v45 }
 0x806   : > { %2200 = vrsqrt.f32 %v1694_v48  ;;  %vm1701_vm12 = vweird.f32 %v1694_v48 }
 0x80c   : > { %v2201_v51 = vpop.eup %2200 }
 0x80d   : > { %v1696_v52 = vmul.f32 %v2201_v51, %v1694_v48  ;;  %vm1702_vm11 = vweird.f32 %v2201_v51 }
 0x80e   : > { %vm1703_vm13 = vmor %vm1701_vm12, %vm1702_vm11 }
 0x80f   : > { %v1697_v53 = vmul.f32 %v2201_v51, %v1696_v52 }
 0x811   : > { %v1698_v54 = vmul.f32 0.5, %v1697_v53 }
 0x813   : > { %v1699_v46 = vsub.f32 1.5, %v1698_v54 }
 0x815   : > { %v1700_v47 = vmul.f32 %v2201_v51, %v1699_v46 }
 0x817   : > { %v1704_v49 = vsel %vm1703_vm13, %v2201_v51, %v1700_v47 }
 0x818   : > { %v1705_v57 = vmul.f32 %v1704_v49, %v1688_v2 }
 0x81a   : > { %v1709_v58 = vmul.f32 %v2178_v55, %v1705_v57  ;;  %1718 = sbr.rel (%p2055_p1) target bundleno = 2221 (0x8ad), region = 92 }
 0x81c   : > { %v1713_v13 = vadd.f32 %v2179_v50, %v1709_v58 }
 0x81e   : > { %1714 = vst.msk [vmem:[#allocation2] sm:$0xff] %vm798_vm1, %v1713_v13 }
 0x81f   : > { %v2088_v59 = vld [vmem:[%s2945_s14 + $0x8] sm:$0xff]  ;;  %v2087_v11 = vld [vmem:[%s2945_s14] sm:$0xff]  ;;  %v1723_v4 = vpack.c.bf16 %v1713_v13, %v1713_v13 }
 0x820   : > { %1749 = vmatpush.bf16.msra.mxu0 %v2088_v59  ;;  %v2202_v12 = vld [vmem:[%s2946_s15] ss:$0 sm:$0xff] }
 0x824   : > { %1750 = vmatpush.bf16.msra.mxu0 %v2087_v11 }
 0x827   : > { %2064 = vmatmul.msk.bf16.vlgmr.msra.gmra.mxu0 %vm798_vm1, %v1723_v4 }
 0x8a4   : > { %v1752_v60 = vpop.f32.mrf.mxu0 }
 0x8a5   : > { %v1753_v62 = vadd.f32 %v2202_v12, %v1752_v60 }
 0x8a7   : > { %1756 = vst [vmem:[%s683_s12] sm:$0xff] %v1753_v62 }
 0x8ac   : > { %v1754_v63 = vpop.f32.mrf.mxu0 }
 0x8ad PF: > { %s2947_s13 = sld [smem:[#allocation10_spill]]  ;;  %s1770_s3 = sshll.u32 %s683_s12, 4  ;;  %s1771_s3 = int_to_ptr.vmem [resolvable:$true] %s1770_s3 }
 0x8ae   : > { %s2948_s4 = sld [smem:[#allocation7_spill]] }
 0x8af   : > { %s2950_s24 = sld [smem:[#allocation30_spill]] }
 0x8b3   : > { %s2066_s25 = sshll.u32 %s2947_s13, 3 }
 0x8b4   : > { %s2952_s29 = sand.u32 1, %s2948_s4  }
 0x8b5   : > { %s2951_s30 = smov %s2950_s24  ;;  %s1768_s27 = scalar_lea.hbm %s2950_s24, %s2066_s25 }
 0x8b6   : > { %s1772_s23 = sshll.u32 %s1768_s27, 4  ;;  %s1758_s0 = scalar_lea.sflag [#allocation4], %s2952_s29  ;;  %s1773_s23 = int_to_ptr.hbm [resolvable:$true] %s1772_s23 }
 0x8b7   : > { %s2217_s19 = sshra.s32 %s1773_s23, 4  ;;  %s2223_s16 = scalar_lea.hbm %s2951_s30, 16  ;;  %s2218_s19 = int_to_ptr.hbm [resolvable:$true] %s2217_s19 }
 0x8b8   : > { %s2219_s21 = scalar_lea.hbm %s2218_s19, 8  ;;  %p2224_p6 = scmp.lt.s32.totalorder %s2218_s19, %s2951_s30 }
 0x8b9   : > { %p2220_p2 = scmp.ne.s32.totalorder %s2218_s19, %s2219_s21  ;;  %p2225_p7 = scmp.lt.s32.totalorder %s2223_s16, %s2219_s21 }
 0x8bb   : > { %p2221_p4 = pnand %p2220_p2, %p2444_p3  ;;  %p2226_p8 = por %p2225_p7, %p2224_p6 }
 0x8bd   : > { %p2222_p5 = pneg %p2221_p4 }
 0x8bf   : > { %p2227_p10 = pnand %p2226_p8, %p2222_p5 }
 0x8c1   : > { %2230 = shalt.err (!%p2227_p10)
}
 0x8c2   : > { %2089 = dma.vmem_to_hbm [thread:$0]  (%p2444_p3), %s1771_s3, 128, %s1773_s23, %s1758_s0  }
 0x8c3 PF: > { %s2953_s26 = sld [smem:[#allocation13_spill]] }
 0x8c4   : > { %s2954_s12 = sld [smem:[#allocation6_spill]] }
 0x8c9   : > { %p2095_p11 = scmp.ge.s32.totalorder %s2953_s26, 2 }
 0x8ca   : > { %s1784_s20 = sand.u32 1, %s2954_s12  }
 0x8cb   : > { %p2092_p12 = pnand %p2095_p11, %p2454_p9  ;;  %s1785_s15 = scalar_lea.sflag [#allocation4], %s1784_s20 }
 0x8cd   : > { %p2093_p13 = pneg %p2092_p12 }
 0x8cf   : > { %2264 = dma.done.wait (%p2093_p13), %s1785_s15, 128  }
 0x8d0   : > { %2266 = vsyncadd (%p2093_p13), %s1785_s15, 4294967168  ;;  %s29_s28 = sadd.s32 1, %s2953_s26   ;;  %s2956_s21 = sld [smem:[#allocation7_spill]] }
 0x8d1   : > { %p26_p0 = scmp.ge.s32.totalorder %s29_s28, 6   ;;  %s2957_s22 = sld [smem:[#allocation8_spill]] }
 0x8d2   : > { %s2958_s23 = sld [smem:[#allocation18_spill]] }
 0x8d3   : > { %s2959_s24 = sld [smem:[#allocation11_spill]]  ;;  %28 = sbr.rel (!%p26_p0) target bundleno = 18 (0x12), region = 166 }
 0x8d4   : > { %s2960_s25 = sld [smem:[#allocation12_spill]] }
 0x8d5   : > { %s2961_s26 = sld [smem:[#allocation14_spill]] }
 0x8d6   : > { %s2962_s27 = sld [smem:[#allocation16_spill]] }
 0x8d8   :  { %1791 = vsyncpa [#allocation4], 1 }
 0x8d9   :  { %1793 = vsyncpa [#allocation4 + $0x1], 1 }

</bundles_post_ra>
